<compile_context>
chip_gen: v5e
topology: v5e:2x2
jax: 0.10.0
libtpu: 0.0.40
codegen_flags: <defaults>
</compile_context>

<pallas_src>
import functools
import math

import jax
import jax.numpy as jnp
from jax.experimental import pallas as pl
from jax.experimental.pallas import tpu as pltpu


# ------------------------------ helpers ------------------------------

def _pick_tile(n, max_tile, align):
    """Largest tile <= max_tile that divides n and is a multiple of `align`;
    falls back to the full axis (a full-extent block dim is always legal)."""
    if n <= max_tile:
        return n
    t = (max_tile // align) * align
    while t >= align:
        if n % t == 0:
            return t
        t -= align
    return n


def _pick_head_group(bh, t, d, max_bytes=4 * 1024 * 1024):
    """Heads (over the fused batch*heads axis) processed per attention grid step.
    Must be a multiple of 8 (sublane granularity) or the whole axis."""
    if bh % 8 != 0:
        return bh
    g = 8
    while bh % (2 * g) == 0 and (2 * g) * (4 * t * d + t * t) * 4 <= max_bytes:
        g *= 2
    return g


def _compiler_params(semantics, block_bytes):
    # Explicit VMEM budget: 2x for double-buffered pipeline buffers + compiler headroom,
    # clamped so the same tiling works on v5e/v6e (128 MiB) and v7x (64 MiB).
    limit = 2 * block_bytes + (4 << 20)
    limit = max(16 << 20, min(limit, 100 << 20))
    return pltpu.CompilerParams(dimension_semantics=semantics,
                                vmem_limit_bytes=limit)


def _layernorm_f32(y, gamma, beta, eps):
    mean = jnp.mean(y, axis=-1, keepdims=True)
    var = jnp.mean(jnp.square(y - mean), axis=-1, keepdims=True)
    return (y - mean) * jax.lax.rsqrt(var + eps) * gamma + beta


# ------------------------------ kernels ------------------------------

def _qkv_kernel(x_ref, w_ref, b_ref, q_ref, k_ref, v_ref):
    # Fused q/k/v projection: one read of the x row-tile, three MXU matmuls, three outputs.
    x = x_ref[...]
    for idx, out_ref in enumerate((q_ref, k_ref, v_ref)):
        y = jnp.dot(x, w_ref[idx], preferred_element_type=jnp.float32)
        y = y + b_ref[idx].astype(jnp.float32)
        out_ref[...] = y.astype(out_ref.dtype)


def qkv_proj(x2d, wqkv, bqkv, tm):
    M, E = x2d.shape
    out = jax.ShapeDtypeStruct((M, E), x2d.dtype)
    blk = 4 * (tm * E + 3 * E * E + 3 * E + 3 * tm * E)
    return pl.pallas_call(
        _qkv_kernel,
        out_shape=(out, out, out),
        grid=(M // tm,),
        in_specs=[
            pl.BlockSpec((tm, E), lambda i: (i, 0)),        # x row tile (pipelined)
            pl.BlockSpec((3, E, E), lambda i: (0, 0, 0)),   # stacked [Wq, Wk, Wv] (resident)
            pl.BlockSpec((3, 1, E), lambda i: (0, 0, 0)),   # stacked biases
        ],
        out_specs=(pl.BlockSpec((tm, E), lambda i: (i, 0)),) * 3,
        compiler_params=_compiler_params(("parallel",), blk),
    )(x2d, wqkv, bqkv)


def _attn_kernel(q_ref, k_ref, v_ref, bias_ref, o_ref, *, scale, group):
    # One group of `group` (batch, head) slices per grid step; q/k/v blocks are (T, G, d)
    # slices of the natural (T, B*H, d) layout, so no host-side transposes are needed.
    for g in range(group):
        q = q_ref[:, g, :]                      # (T, d)
        k = k_ref[:, g, :]                      # (T, d)
        v = v_ref[:, g, :]                      # (T, d)
        # contract last dims directly -> no materialized k.T
        s = jax.lax.dot_general(q, k, (((1,), (1,)), ((), ())),
                                preferred_element_type=jnp.float32)   # (T, T)
        s = s * scale + bias_ref[g].astype(jnp.float32)
        m = jnp.max(s, axis=-1, keepdims=True)
        p = jnp.exp(s - m)
        p = p * pl.reciprocal(jnp.sum(p, axis=-1, keepdims=True), approx=True)  # EUP vrcp
        o = jnp.dot(p.astype(v.dtype), v, preferred_element_type=jnp.float32)   # (T, d)
        o_ref[:, g, :] = o.astype(o_ref.dtype)
    # TODO(synk): for real model sizes, a (T, G*d) 2-D block view would make the output
    # stores fully lane-dense (>=128 lanes); kept 3-D here because the tiny demo dims
    # (d=8) cannot satisfy the 128-lane block divisibility in that view.


def attention(q3, k3, v3, bias, scale, group):
    T, BH, d = q3.shape
    qkv_spec = pl.BlockSpec((T, group, d), lambda i: (0, i, 0))
    blk = 4 * (4 * T * group * d + group * T * T)
    return pl.pallas_call(
        functools.partial(_attn_kernel, scale=scale, group=group),
        out_shape=jax.ShapeDtypeStruct((T, BH, d), q3.dtype),
        grid=(BH // group,),
        in_specs=[qkv_spec, qkv_spec, qkv_spec,
                  pl.BlockSpec((group, T, T), lambda i: (i, 0, 0))],
        out_specs=qkv_spec,
        compiler_params=_compiler_params(("parallel",), blk),
    )(q3, k3, v3, bias)


def _oproj_ln_kernel(a_ref, res_ref, w_ref, b_ref, g_ref, beta_ref, o_ref, *, eps):
    # y = LayerNorm(residual + attn @ Wo + bo), all in one pass over the row tile.
    y = jnp.dot(a_ref[...], w_ref[...], preferred_element_type=jnp.float32)
    y = y + b_ref[...].astype(jnp.float32) + res_ref[...].astype(jnp.float32)
    y = _layernorm_f32(y, g_ref[...].astype(jnp.float32),
                       beta_ref[...].astype(jnp.float32), eps)
    o_ref[...] = y.astype(o_ref.dtype)


def out_proj_residual_ln(a2d, res2d, w, b, gamma, beta, tm, eps):
    M, E = a2d.shape
    vec = lambda z: z.reshape(1, E).astype(jnp.float32)
    blk = 4 * (3 * tm * E + E * E + 3 * E)
    return pl.pallas_call(
        functools.partial(_oproj_ln_kernel, eps=eps),
        out_shape=jax.ShapeDtypeStruct((M, E), a2d.dtype),
        grid=(M // tm,),
        in_specs=[
            pl.BlockSpec((tm, E), lambda i: (i, 0)),   # attention output row tile
            pl.BlockSpec((tm, E), lambda i: (i, 0)),   # residual (layer input) row tile
            pl.BlockSpec((E, E), lambda i: (0, 0)),    # W_o (resident)
            pl.BlockSpec((1, E), lambda i: (0, 0)),    # b_o
            pl.BlockSpec((1, E), lambda i: (0, 0)),    # gamma1
            pl.BlockSpec((1, E), lambda i: (0, 0)),    # beta1
        ],
        out_specs=pl.BlockSpec((tm, E), lambda i: (i, 0)),
        compiler_params=_compiler_params(("parallel",), blk),
    )(a2d, res2d, w, vec(b), vec(gamma), vec(beta))


def _ffn_kernel(x_ref, w1_ref, b1_ref, w2_ref, b2_ref, g_ref, beta_ref, o_ref,
                acc_ref, *, eps):
    # grid = (row_tiles [parallel], ffn_tiles [arbitrary reduction])
    j = pl.program_id(1)

    @pl.when(j == 0)
    def _():
        acc_ref[...] = jnp.zeros_like(acc_ref)

    x = x_ref[...]
    h = jnp.dot(x, w1_ref[...], preferred_element_type=jnp.float32)
    h = jnp.maximum(h + b1_ref[...].astype(jnp.float32), 0.0)         # fused ReLU
    acc_ref[...] += jnp.dot(h.astype(w2_ref.dtype), w2_ref[...],
                            preferred_element_type=jnp.float32)

    @pl.when(j == pl.num_programs(1) - 1)
    def _():
        y = acc_ref[...] + b2_ref[...].astype(jnp.float32) + x_ref[...].astype(jnp.float32)
        y = _layernorm_f32(y, g_ref[...].astype(jnp.float32),
                           beta_ref[...].astype(jnp.float32), eps)
        o_ref[...] = y.astype(o_ref.dtype)


def ffn_residual_ln(x2d, w1, b1, w2, b2, gamma, beta, tm, tf, eps, out_dtype):
    M, E = x2d.shape
    F = w1.shape[1]
    vec = lambda z, n: z.reshape(1, n).astype(jnp.float32)
    blk = 4 * (3 * tm * E + 2 * E * tf + tf + 3 * E)
    return pl.pallas_call(
        functools.partial(_ffn_kernel, eps=eps),
        out_shape=jax.ShapeDtypeStruct((M, E), out_dtype),
        grid=(M // tm, F // tf),
        in_specs=[
            pl.BlockSpec((tm, E), lambda i, j: (i, 0)),   # x row tile (also the residual)
            pl.BlockSpec((E, tf), lambda i, j: (0, j)),   # W1 tile over FFN dim
            pl.BlockSpec((1, tf), lambda i, j: (0, j)),   # b1 tile
            pl.BlockSpec((tf, E), lambda i, j: (j, 0)),   # W2 tile over FFN dim
            pl.BlockSpec((1, E), lambda i, j: (0, 0)),    # b2
            pl.BlockSpec((1, E), lambda i, j: (0, 0)),    # gamma2
            pl.BlockSpec((1, E), lambda i, j: (0, 0)),    # beta2
        ],
        out_specs=pl.BlockSpec((tm, E), lambda i, j: (i, 0)),
        scratch_shapes=[pltpu.VMEM((tm, E), jnp.float32)],
        compiler_params=_compiler_params(("parallel", "arbitrary"), blk),
    )(x2d, w1, vec(b1, F), w2, vec(b2, E), vec(gamma, E), vec(beta, E))


# ------------------------------ layer wrapper ------------------------------

def graphormer_encoder_layer(x, self_attn_bias, params, num_heads,
                             compute_dtype=jnp.float32, eps=1e-5):
    """x: (T, B, E); self_attn_bias: (B*H, T, T) additive attention bias.
    Returns (y, attn) with attn=None (need_weights=False path), matching PyTorch."""
    T, B, E = x.shape
    H = num_heads
    d = E // H
    BH = B * H
    M = T * B
    F = params["w1"].shape[1]
    scale = d ** (-0.5)
    out_dtype = x.dtype

    # --- param prep (tiny, once per call): stacked QKV weights; matmul operands in
    #     compute_dtype (bf16 recommended on v6e/v7x); biases / LN params stay f32. ---
    wqkv = jnp.stack([params["wq"], params["wk"], params["wv"]], axis=0).astype(compute_dtype)
    bqkv = jnp.stack([params["bq"], params["bk"], params["bv"]],
                     axis=0).reshape(3, 1, E).astype(jnp.float32)
    wo = params["wo"].astype(compute_dtype)
    w1 = params["w1"].astype(compute_dtype)
    w2 = params["w2"].astype(compute_dtype)

    tm = _pick_tile(M, 256, 8)        # row tile over T*B (pipelined, megacore-parallel)
    tf = _pick_tile(F, 1024, 128)     # FFN reduction tile (bounds VMEM for big FFN dims)
    G = _pick_head_group(BH, T, d)    # (batch*head) slices per attention grid step

    x2d = x.astype(compute_dtype).reshape(M, E)   # free: (T,B,E) row-major == (T*B,E)

    # ---- 1) fused QKV projection (x read once) ----
    q2d, k2d, v2d = qkv_proj(x2d, wqkv, bqkv, tm)

    # Free bitcast views into the (T, B*H, d) multi-head layout of MultiheadAttention.
    q3 = q2d.reshape(T, BH, d)
    k3 = k2d.reshape(T, BH, d)
    v3 = v2d.reshape(T, BH, d)

    # ---- 2) grouped multi-head attention (no host/XLA transposes anywhere) ----
    # TODO(synk): self_attn_mask / self_attn_padding_mask can be folded into
    # self_attn_bias as additive -inf terms (guard all--inf rows); not exercised here
    # since the PyTorch call passes them as None.
    attn3 = attention(q3, k3, v3, self_attn_bias, scale, G)
    attn2d = attn3.reshape(M, E)                  # free

    # ---- 3) out-proj + residual + LayerNorm1 (fused) ----
    x2d = out_proj_residual_ln(attn2d, x2d, wo, params["bo"],
                               params["ln1_g"], params["ln1_b"], tm, eps)

    # ---- 4) FFN (fc1+ReLU+fc2 accumulated in VMEM) + residual + LayerNorm2 (fused) ----
    y2d = ffn_residual_ln(x2d, w1, params["b1"], w2, params["b2"],
                          params["ln2_g"], params["ln2_b"], tm, tf, eps, out_dtype)

    return y2d.reshape(T, B, E), None   # attn weights not requested (need_weights=False)


# ------------------------------ deterministic params ------------------------------

def xavier_uniform(key, out_dim, in_dim, gain=1.0):
    bound = gain * math.sqrt(6.0 / (in_dim + out_dim))
    w = jax.random.uniform(key, (out_dim, in_dim), jnp.float32, -bound, bound)
    return w.T  # stored as (in, out) for the kernels


def init_params(key, embed_dim, ffn_dim):
    keys = jax.random.split(key, 12)
    g = 1.0 / math.sqrt(2.0)
    return {
        "wq": xavier_uniform(keys[0], embed_dim, embed_dim, gain=g),
        "wk": xavier_uniform(keys[1], embed_dim, embed_dim, gain=g),
        "wv": xavier_uniform(keys[2], embed_dim, embed_dim, gain=g),
        "wo": xavier_uniform(keys[3], embed_dim, embed_dim, gain=1.0),
        "bq": jax.random.normal(keys[4], (embed_dim,), jnp.float32) * 0.02,
        "bk": jax.random.normal(keys[5], (embed_dim,), jnp.float32) * 0.02,
        "bv": jax.random.normal(keys[6], (embed_dim,), jnp.float32) * 0.02,
        "bo": jnp.zeros((embed_dim,), jnp.float32),
        "w1": xavier_uniform(keys[7], ffn_dim, embed_dim, gain=1.0),
        "b1": jax.random.normal(keys[8], (ffn_dim,), jnp.float32) * 0.02,
        "w2": xavier_uniform(keys[9], embed_dim, ffn_dim, gain=1.0),
        "b2": jax.random.normal(keys[10], (embed_dim,), jnp.float32) * 0.02,
        "ln1_g": jnp.ones((embed_dim,), jnp.float32),
        "ln1_b": jnp.zeros((embed_dim,), jnp.float32),
        "ln2_g": jnp.ones((embed_dim,), jnp.float32),
        "ln2_b": jnp.zeros((embed_dim,), jnp.float32),
    }


# ------------------------------ pure-JAX reference ------------------------------

def reference_layer(x, bias, params, num_heads, eps=1e-5):
    T, B, E = x.shape
    H = num_heads
    d = E // H
    scale = d ** (-0.5)
    x2d = x.reshape(T * B, E)
    residual = x2d
    q = (x2d @ params["wq"] + params["bq"]) * scale
    k = x2d @ params["wk"] + params["bk"]
    v = x2d @ params["wv"] + params["bv"]
    qh = q.reshape(T, B * H, d).transpose(1, 0, 2)
    kh = k.reshape(T, B * H, d).transpose(1, 0, 2)
    vh = v.reshape(T, B * H, d).transpose(1, 0, 2)
    s = jnp.einsum("btd,bsd->bts", qh, kh) + bias
    p = jax.nn.softmax(s, axis=-1)
    a = jnp.einsum("bts,bsd->btd", p, vh)
    a2d = a.transpose(1, 0, 2).reshape(T * B, E)
    a2d = a2d @ params["wo"] + params["bo"]

    def ln(z, g, b):
        m = jnp.mean(z, -1, keepdims=True)
        var = jnp.mean((z - m) ** 2, -1, keepdims=True)
        return (z - m) / jnp.sqrt(var + eps) * g + b

    x2d = ln(residual + a2d, params["ln1_g"], params["ln1_b"])
    residual = x2d
    h = jnp.maximum(x2d @ params["w1"] + params["b1"], 0.0)
    h = h @ params["w2"] + params["b2"]
    x2d = ln(residual + h, params["ln2_g"], params["ln2_b"])
    return x2d.reshape(T, B, E)


# ------------------------------ main ------------------------------

if __name__ == "__main__":
    T, B, E, H = 8, 2, 32, 4          # seq, batch, embed_dim, heads  (head_dim = 8)
    FFN = 64

    key = jax.random.PRNGKey(0)
    kx, kb, kp = jax.random.split(key, 3)

    x = jax.random.normal(kx, (T, B, E), jnp.float32)                    # Time x Batch x Channel
    attn_bias = jax.random.normal(kb, (B * H, T, T), jnp.float32) * 0.1  # additive graph bias
    params = init_params(kp, E, FFN)

    layer = jax.jit(graphormer_encoder_layer,
                    static_argnames=("num_heads", "compute_dtype", "eps"))

    # f32 path (works on all generations)
    y, attn = layer(x, attn_bias, params, num_heads=H)
    y = jax.block_until_ready(y)
    y_ref = reference_layer(x, attn_bias, params, num_heads=H)
    assert attn is None  # need_weights=False path, same as the PyTorch layer
    # tolerance covers the EUP approx-reciprocal softmax denominator (~1e-4 relative)
    assert jnp.allclose(y, y_ref, rtol=1e-2, atol=1e-2), "f32 kernel mismatch vs reference"

    # bf16 matmul-operand path (recommended on v6e/v7x); softmax/LN stay f32 inside.
    y16, _ = layer(x, attn_bias, params, num_heads=H, compute_dtype=jnp.bfloat16)
    y16 = jax.block_until_ready(y16)
    assert jnp.allclose(y16.astype(jnp.float32), y_ref, rtol=1e-1, atol=1e-1), \
        "bf16 kernel mismatch vs reference"

    print("KERNEL_OK")
</pallas_src>

<mosaic_0001>
module attributes {stable_mosaic.version = 11 : i64} {
  func.func @_qkv_kernel(%arg0: i32, %arg1: memref<16x32xf32, #tpu.memory_space<vmem>>, %arg2: memref<3x32x32xf32, #tpu.memory_space<vmem>>, %arg3: memref<3x1x32xf32, #tpu.memory_space<vmem>>, %arg4: memref<16x32xf32, #tpu.memory_space<vmem>>, %arg5: memref<16x32xf32, #tpu.memory_space<vmem>>, %arg6: memref<16x32xf32, #tpu.memory_space<vmem>>) attributes {dimension_semantics = [#tpu.dimension_semantics<parallel>], iteration_bounds = array<i64: 1>, scalar_prefetch = 0 : i64, scratch_operands = 0 : i64, tpu.core_type = #tpu.core_type<tc>, window_params = [{transform_indices = @transform_0, window_bounds = array<i64: 16, 32>}, {pipeline_mode = #tpu.pipeline_mode<synchronous>, transform_indices = @transform_1, window_bounds = array<i64: 3, 32, 32>}, {pipeline_mode = #tpu.pipeline_mode<synchronous>, transform_indices = @transform_2, window_bounds = array<i64: 3, 1, 32>}, {transform_indices = @transform_3, window_bounds = array<i64: 16, 32>}, {transform_indices = @transform_4, window_bounds = array<i64: 16, 32>}, {transform_indices = @transform_5, window_bounds = array<i64: 16, 32>}]} {
    %c0 = arith.constant 0 : index
    %c0_0 = arith.constant 0 : index
    %0 = vector.load %arg1[%c0, %c0_0] : memref<16x32xf32, #tpu.memory_space<vmem>>, vector<16x32xf32>
    %c0_1 = arith.constant 0 : index
    %c0_2 = arith.constant 0 : index
    %c0_3 = arith.constant 0 : index
    %1 = vector.load %arg2[%c0_1, %c0_2, %c0_3] : memref<3x32x32xf32, #tpu.memory_space<vmem>>, vector<1x32x32xf32>
    %2 = vector.shape_cast %1 : vector<1x32x32xf32> to vector<32x32xf32>
    %cst = arith.constant dense<0.000000e+00> : vector<16x32xf32>
    %3 = tpu.matmul %0, %2, %cst {dimension_numbers = #tpu.dot_dimension_numbers<[1], [0], [0], [1], [0, 0, 1, 1], [], []>} : vector<16x32xf32>, vector<32x32xf32>, vector<16x32xf32> -> vector<16x32xf32>
    %c0_4 = arith.constant 0 : index
    %c0_5 = arith.constant 0 : index
    %c0_6 = arith.constant 0 : index
    %4 = vector.load %arg3[%c0_4, %c0_5, %c0_6] : memref<3x1x32xf32, #tpu.memory_space<vmem>>, vector<1x1x32xf32>
    %5 = vector.shape_cast %4 : vector<1x1x32xf32> to vector<1x32xf32>
    %6 = vector.broadcast %5 : vector<1x32xf32> to vector<16x32xf32>
    %7 = arith.addf %3, %6 : vector<16x32xf32>
    %c0_7 = arith.constant 0 : index
    %c0_8 = arith.constant 0 : index
    %8 = vector.load %arg4[%c0_7, %c0_8] : memref<16x32xf32, #tpu.memory_space<vmem>>, vector<16x32xf32>
    tpu.vector_store %arg4[%c0_7, %c0_8], %7 {strides = array<i32>} : memref<16x32xf32, #tpu.memory_space<vmem>>, vector<16x32xf32>,
    %c1 = arith.constant 1 : index
    %c0_9 = arith.constant 0 : index
    %c0_10 = arith.constant 0 : index
    %9 = vector.load %arg2[%c1, %c0_9, %c0_10] : memref<3x32x32xf32, #tpu.memory_space<vmem>>, vector<1x32x32xf32>
    %10 = vector.shape_cast %9 : vector<1x32x32xf32> to vector<32x32xf32>
    %cst_11 = arith.constant dense<0.000000e+00> : vector<16x32xf32>
    %11 = tpu.matmul %0, %10, %cst_11 {dimension_numbers = #tpu.dot_dimension_numbers<[1], [0], [0], [1], [0, 0, 1, 1], [], []>} : vector<16x32xf32>, vector<32x32xf32>, vector<16x32xf32> -> vector<16x32xf32>
    %c1_12 = arith.constant 1 : index
    %c0_13 = arith.constant 0 : index
    %c0_14 = arith.constant 0 : index
    %12 = vector.load %arg3[%c1_12, %c0_13, %c0_14] : memref<3x1x32xf32, #tpu.memory_space<vmem>>, vector<1x1x32xf32>
    %13 = vector.shape_cast %12 : vector<1x1x32xf32> to vector<1x32xf32>
    %14 = vector.broadcast %13 : vector<1x32xf32> to vector<16x32xf32>
    %15 = arith.addf %11, %14 : vector<16x32xf32>
    %c0_15 = arith.constant 0 : index
    %c0_16 = arith.constant 0 : index
    %16 = vector.load %arg5[%c0_15, %c0_16] : memref<16x32xf32, #tpu.memory_space<vmem>>, vector<16x32xf32>
    tpu.vector_store %arg5[%c0_15, %c0_16], %15 {strides = array<i32>} : memref<16x32xf32, #tpu.memory_space<vmem>>, vector<16x32xf32>,
    %c2 = arith.constant 2 : index
    %c0_17 = arith.constant 0 : index
    %c0_18 = arith.constant 0 : index
    %17 = vector.load %arg2[%c2, %c0_17, %c0_18] : memref<3x32x32xf32, #tpu.memory_space<vmem>>, vector<1x32x32xf32>
    %18 = vector.shape_cast %17 : vector<1x32x32xf32> to vector<32x32xf32>
    %cst_19 = arith.constant dense<0.000000e+00> : vector<16x32xf32>
    %19 = tpu.matmul %0, %18, %cst_19 {dimension_numbers = #tpu.dot_dimension_numbers<[1], [0], [0], [1], [0, 0, 1, 1], [], []>} : vector<16x32xf32>, vector<32x32xf32>, vector<16x32xf32> -> vector<16x32xf32>
    %c2_20 = arith.constant 2 : index
    %c0_21 = arith.constant 0 : index
    %c0_22 = arith.constant 0 : index
    %20 = vector.load %arg3[%c2_20, %c0_21, %c0_22] : memref<3x1x32xf32, #tpu.memory_space<vmem>>, vector<1x1x32xf32>
    %21 = vector.shape_cast %20 : vector<1x1x32xf32> to vector<1x32xf32>
    %22 = vector.broadcast %21 : vector<1x32xf32> to vector<16x32xf32>
    %23 = arith.addf %19, %22 : vector<16x32xf32>
    %c0_23 = arith.constant 0 : index
    %c0_24 = arith.constant 0 : index
    %24 = vector.load %arg6[%c0_23, %c0_24] : memref<16x32xf32, #tpu.memory_space<vmem>>, vector<16x32xf32>
    tpu.vector_store %arg6[%c0_23, %c0_24], %23 {strides = array<i32>} : memref<16x32xf32, #tpu.memory_space<vmem>>, vector<16x32xf32>,
    return
  }
  func.func @transform_0(%arg0: i32) -> (i32, i32) {
    %c0_i32 = arith.constant 0 : i32
    %c0_i32_0 = arith.constant 0 : i32
    return %arg0, %c0_i32 : i32, i32
  }
  func.func @transform_1(%arg0: i32) -> (i32, i32, i32) {
    %c0_i32 = arith.constant 0 : i32
    %c0_i32_0 = arith.constant 0 : i32
    %c0_i32_1 = arith.constant 0 : i32
    %c0_i32_2 = arith.constant 0 : i32
    return %c0_i32, %c0_i32_0, %c0_i32_1 : i32, i32, i32
  }
  func.func @transform_2(%arg0: i32) -> (i32, i32, i32) {
    %c0_i32 = arith.constant 0 : i32
    %c0_i32_0 = arith.constant 0 : i32
    %c0_i32_1 = arith.constant 0 : i32
    %c0_i32_2 = arith.constant 0 : i32
    return %c0_i32, %c0_i32_0, %c0_i32_1 : i32, i32, i32
  }
  func.func @transform_3(%arg0: i32) -> (i32, i32) {
    %c0_i32 = arith.constant 0 : i32
    %c0_i32_0 = arith.constant 0 : i32
    return %arg0, %c0_i32 : i32, i32
  }
  func.func @transform_4(%arg0: i32) -> (i32, i32) {
    %c0_i32 = arith.constant 0 : i32
    %c0_i32_0 = arith.constant 0 : i32
    return %arg0, %c0_i32 : i32, i32
  }
  func.func @transform_5(%arg0: i32) -> (i32, i32) {
    %c0_i32 = arith.constant 0 : i32
    %c0_i32_0 = arith.constant 0 : i32
    return %arg0, %c0_i32 : i32, i32
  }
}

module attributes {stable_mosaic.version = 11 : i64} {
  func.func @_oproj_ln_kernel(%arg0: i32, %arg1: memref<16x32xf32, #tpu.memory_space<vmem>>, %arg2: memref<16x32xf32, #tpu.memory_space<vmem>>, %arg3: memref<32x32xf32, #tpu.memory_space<vmem>>, %arg4: memref<1x32xf32, #tpu.memory_space<vmem>>, %arg5: memref<1x32xf32, #tpu.memory_space<vmem>>, %arg6: memref<1x32xf32, #tpu.memory_space<vmem>>, %arg7: memref<16x32xf32, #tpu.memory_space<vmem>>) attributes {dimension_semantics = [#tpu.dimension_semantics<parallel>], iteration_bounds = array<i64: 1>, scalar_prefetch = 0 : i64, scratch_operands = 0 : i64, tpu.core_type = #tpu.core_type<tc>, window_params = [{transform_indices = @transform_0, window_bounds = array<i64: 16, 32>}, {transform_indices = @transform_1, window_bounds = array<i64: 16, 32>}, {pipeline_mode = #tpu.pipeline_mode<synchronous>, transform_indices = @transform_2, window_bounds = array<i64: 32, 32>}, {pipeline_mode = #tpu.pipeline_mode<synchronous>, transform_indices = @transform_3, window_bounds = array<i64: 1, 32>}, {pipeline_mode = #tpu.pipeline_mode<synchronous>, transform_indices = @transform_4, window_bounds = array<i64: 1, 32>}, {pipeline_mode = #tpu.pipeline_mode<synchronous>, transform_indices = @transform_5, window_bounds = array<i64: 1, 32>}, {transform_indices = @transform_6, window_bounds = array<i64: 16, 32>}]} {
    %c0 = arith.constant 0 : index
    %c0_0 = arith.constant 0 : index
    %0 = vector.load %arg1[%c0, %c0_0] : memref<16x32xf32, #tpu.memory_space<vmem>>, vector<16x32xf32>
    %c0_1 = arith.constant 0 : index
    %c0_2 = arith.constant 0 : index
    %1 = vector.load %arg3[%c0_1, %c0_2] : memref<32x32xf32, #tpu.memory_space<vmem>>, vector<32x32xf32>
    %cst = arith.constant dense<0.000000e+00> : vector<16x32xf32>
    %2 = tpu.matmul %0, %1, %cst {dimension_numbers = #tpu.dot_dimension_numbers<[1], [0], [0], [1], [0, 0, 1, 1], [], []>} : vector<16x32xf32>, vector<32x32xf32>, vector<16x32xf32> -> vector<16x32xf32>
    %c0_3 = arith.constant 0 : index
    %c0_4 = arith.constant 0 : index
    %3 = vector.load %arg4[%c0_3, %c0_4] : memref<1x32xf32, #tpu.memory_space<vmem>>, vector<1x32xf32>
    %4 = vector.broadcast %3 : vector<1x32xf32> to vector<16x32xf32>
    %5 = arith.addf %2, %4 : vector<16x32xf32>
    %c0_5 = arith.constant 0 : index
    %c0_6 = arith.constant 0 : index
    %6 = vector.load %arg2[%c0_5, %c0_6] : memref<16x32xf32, #tpu.memory_space<vmem>>, vector<16x32xf32>
    %7 = arith.addf %5, %6 : vector<16x32xf32>
    %c0_7 = arith.constant 0 : index
    %c0_8 = arith.constant 0 : index
    %8 = vector.load %arg5[%c0_7, %c0_8] : memref<1x32xf32, #tpu.memory_space<vmem>>, vector<1x32xf32>
    %c0_9 = arith.constant 0 : index
    %c0_10 = arith.constant 0 : index
    %9 = vector.load %arg6[%c0_9, %c0_10] : memref<1x32xf32, #tpu.memory_space<vmem>>, vector<1x32xf32>
    %cst_11 = arith.constant dense<0.000000e+00> : vector<16xf32>
    %10 = vector.multi_reduction <add>, %7, %cst_11 [1] : vector<16x32xf32> to vector<16xf32>
    %11 = vector.shape_cast %10 : vector<16xf32> to vector<16x1xf32>
    %cst_12 = arith.constant 3.200000e+01 : f32
    %12 = vector.broadcast %cst_12 : f32 to vector<16x1xf32>
    %13 = arith.divf %11, %12 : vector<16x1xf32>
    %14 = vector.broadcast %13 : vector<16x1xf32> to vector<16x32xf32>
    %15 = arith.subf %7, %14 : vector<16x32xf32>
    %16 = arith.mulf %15, %15 : vector<16x32xf32>
    %cst_13 = arith.constant dense<0.000000e+00> : vector<16xf32>
    %17 = vector.multi_reduction <add>, %16, %cst_13 [1] : vector<16x32xf32> to vector<16xf32>
    %18 = vector.shape_cast %17 : vector<16xf32> to vector<16x1xf32>
    %cst_14 = arith.constant 3.200000e+01 : f32
    %19 = vector.broadcast %cst_14 : f32 to vector<16x1xf32>
    %20 = arith.divf %18, %19 : vector<16x1xf32>
    %21 = vector.broadcast %13 : vector<16x1xf32> to vector<16x32xf32>
    %22 = arith.subf %7, %21 : vector<16x32xf32>
    %cst_15 = arith.constant 9.99999974E-6 : f32
    %23 = vector.broadcast %cst_15 : f32 to vector<16x1xf32>
    %24 = arith.addf %20, %23 : vector<16x1xf32>
    %25 = math.rsqrt %24 : vector<16x1xf32>
    %26 = vector.broadcast %25 : vector<16x1xf32> to vector<16x32xf32>
    %27 = arith.mulf %22, %26 : vector<16x32xf32>
    %28 = vector.broadcast %8 : vector<1x32xf32> to vector<16x32xf32>
    %29 = arith.mulf %27, %28 : vector<16x32xf32>
    %30 = vector.broadcast %9 : vector<1x32xf32> to vector<16x32xf32>
    %31 = arith.addf %29, %30 : vector<16x32xf32>
    %c0_16 = arith.constant 0 : index
    %c0_17 = arith.constant 0 : index
    %32 = vector.load %arg7[%c0_16, %c0_17] : memref<16x32xf32, #tpu.memory_space<vmem>>, vector<16x32xf32>
    tpu.vector_store %arg7[%c0_16, %c0_17], %31 {strides = array<i32>} : memref<16x32xf32, #tpu.memory_space<vmem>>, vector<16x32xf32>,
    return
  }
  func.func @transform_0(%arg0: i32) -> (i32, i32) {
    %c0_i32 = arith.constant 0 : i32
    %c0_i32_0 = arith.constant 0 : i32
    return %arg0, %c0_i32 : i32, i32
  }
  func.func @transform_1(%arg0: i32) -> (i32, i32) {
    %c0_i32 = arith.constant 0 : i32
    %c0_i32_0 = arith.constant 0 : i32
    return %arg0, %c0_i32 : i32, i32
  }
  func.func @transform_2(%arg0: i32) -> (i32, i32) {
    %c0_i32 = arith.constant 0 : i32
    %c0_i32_0 = arith.constant 0 : i32
    %c0_i32_1 = arith.constant 0 : i32
    return %c0_i32, %c0_i32_0 : i32, i32
  }
  func.func @transform_3(%arg0: i32) -> (i32, i32) {
    %c0_i32 = arith.constant 0 : i32
    %c0_i32_0 = arith.constant 0 : i32
    %c0_i32_1 = arith.constant 0 : i32
    return %c0_i32, %c0_i32_0 : i32, i32
  }
  func.func @transform_4(%arg0: i32) -> (i32, i32) {
    %c0_i32 = arith.constant 0 : i32
    %c0_i32_0 = arith.constant 0 : i32
    %c0_i32_1 = arith.constant 0 : i32
    return %c0_i32, %c0_i32_0 : i32, i32
  }
  func.func @transform_5(%arg0: i32) -> (i32, i32) {
    %c0_i32 = arith.constant 0 : i32
    %c0_i32_0 = arith.constant 0 : i32
    %c0_i32_1 = arith.constant 0 : i32
    return %c0_i32, %c0_i32_0 : i32, i32
  }
  func.func @transform_6(%arg0: i32) -> (i32, i32) {
    %c0_i32 = arith.constant 0 : i32
    %c0_i32_0 = arith.constant 0 : i32
    return %arg0, %c0_i32 : i32, i32
  }
}

module attributes {stable_mosaic.version = 11 : i64} {
  func.func @_attn_kernel(%arg0: i32, %arg1: memref<8x8x8xf32, #tpu.memory_space<vmem>>, %arg2: memref<8x8x8xf32, #tpu.memory_space<vmem>>, %arg3: memref<8x8x8xf32, #tpu.memory_space<vmem>>, %arg4: memref<8x8x8xf32, #tpu.memory_space<vmem>>, %arg5: memref<8x8x8xf32, #tpu.memory_space<vmem>>) attributes {dimension_semantics = [#tpu.dimension_semantics<parallel>], iteration_bounds = array<i64: 1>, scalar_prefetch = 0 : i64, scratch_operands = 0 : i64, tpu.core_type = #tpu.core_type<tc>, window_params = [{transform_indices = @transform_0, window_bounds = array<i64: 8, 8, 8>}, {transform_indices = @transform_1, window_bounds = array<i64: 8, 8, 8>}, {transform_indices = @transform_2, window_bounds = array<i64: 8, 8, 8>}, {transform_indices = @transform_3, window_bounds = array<i64: 8, 8, 8>}, {transform_indices = @transform_4, window_bounds = array<i64: 8, 8, 8>}]} {
    %c0 = arith.constant 0 : index
    %c0_0 = arith.constant 0 : index
    %c0_1 = arith.constant 0 : index
    %0 = vector.load %arg1[%c0, %c0_0, %c0_1] : memref<8x8x8xf32, #tpu.memory_space<vmem>>, vector<8x1x8xf32>
    %1 = vector.shape_cast %0 : vector<8x1x8xf32> to vector<8x8xf32>
    %c0_2 = arith.constant 0 : index
    %c0_3 = arith.constant 0 : index
    %c0_4 = arith.constant 0 : index
    %2 = vector.load %arg2[%c0_2, %c0_3, %c0_4] : memref<8x8x8xf32, #tpu.memory_space<vmem>>, vector<8x1x8xf32>
    %3 = vector.shape_cast %2 : vector<8x1x8xf32> to vector<8x8xf32>
    %c0_5 = arith.constant 0 : index
    %c0_6 = arith.constant 0 : index
    %c0_7 = arith.constant 0 : index
    %4 = vector.load %arg3[%c0_5, %c0_6, %c0_7] : memref<8x8x8xf32, #tpu.memory_space<vmem>>, vector<8x1x8xf32>
    %5 = vector.shape_cast %4 : vector<8x1x8xf32> to vector<8x8xf32>
    %cst = arith.constant dense<0.000000e+00> : vector<8x8xf32>
    %6 = tpu.matmul %1, %3, %cst {dimension_numbers = #tpu.dot_dimension_numbers<[1], [1], [0], [0], [0, 0, 1, 0], [], []>} : vector<8x8xf32>, vector<8x8xf32>, vector<8x8xf32> -> vector<8x8xf32>
    %cst_8 = arith.constant 0.353553385 : f32
    %7 = vector.broadcast %cst_8 : f32 to vector<8x8xf32>
    %8 = arith.mulf %6, %7 : vector<8x8xf32>
    %c0_9 = arith.constant 0 : index
    %c0_10 = arith.constant 0 : index
    %c0_11 = arith.constant 0 : index
    %9 = vector.load %arg4[%c0_9, %c0_10, %c0_11] : memref<8x8x8xf32, #tpu.memory_space<vmem>>, vector<1x8x8xf32>
    %10 = vector.shape_cast %9 : vector<1x8x8xf32> to vector<8x8xf32>
    %11 = arith.addf %8, %10 : vector<8x8xf32>
    %cst_12 = arith.constant dense<0xFF800000> : vector<8xf32>
    %12 = vector.multi_reduction <maximumf>, %11, %cst_12 [1] : vector<8x8xf32> to vector<8xf32>
    %13 = vector.shape_cast %12 : vector<8xf32> to vector<8x1xf32>
    %14 = vector.broadcast %13 : vector<8x1xf32> to vector<8x8xf32>
    %15 = arith.subf %11, %14 : vector<8x8xf32>
    %16 = math.exp %15 : vector<8x8xf32>
    %cst_13 = arith.constant dense<0.000000e+00> : vector<8xf32>
    %17 = vector.multi_reduction <add>, %16, %cst_13 [1] : vector<8x8xf32> to vector<8xf32>
    %18 = vector.shape_cast %17 : vector<8xf32> to vector<8x1xf32>
    %19 = tpu.reciprocal %18 {approx = true} : vector<8x1xf32> -> vector<8x1xf32>
    %20 = vector.broadcast %19 : vector<8x1xf32> to vector<8x8xf32>
    %21 = arith.mulf %16, %20 : vector<8x8xf32>
    %cst_14 = arith.constant dense<0.000000e+00> : vector<8x8xf32>
    %22 = tpu.matmul %21, %5, %cst_14 {dimension_numbers = #tpu.dot_dimension_numbers<[1], [0], [0], [1], [0, 0, 1, 1], [], []>} : vector<8x8xf32>, vector<8x8xf32>, vector<8x8xf32> -> vector<8x8xf32>
    %c0_15 = arith.constant 0 : index
    %c0_16 = arith.constant 0 : index
    %c0_17 = arith.constant 0 : index
    %23 = vector.load %arg5[%c0_15, %c0_16, %c0_17] : memref<8x8x8xf32, #tpu.memory_space<vmem>>, vector<8x1x8xf32>
    %24 = vector.shape_cast %23 : vector<8x1x8xf32> to vector<8x8xf32>
    %25 = vector.shape_cast %22 : vector<8x8xf32> to vector<8x1x8xf32>
    tpu.vector_store %arg5[%c0_15, %c0_16, %c0_17], %25 {strides = array<i32>} : memref<8x8x8xf32, #tpu.memory_space<vmem>>, vector<8x1x8xf32>,
    %c0_18 = arith.constant 0 : index
    %c1 = arith.constant 1 : index
    %c0_19 = arith.constant 0 : index
    %26 = vector.load %arg1[%c0_18, %c1, %c0_19] : memref<8x8x8xf32, #tpu.memory_space<vmem>>, vector<8x1x8xf32>
    %27 = vector.shape_cast %26 : vector<8x1x8xf32> to vector<8x8xf32>
    %c0_20 = arith.constant 0 : index
    %c1_21 = arith.constant 1 : index
    %c0_22 = arith.constant 0 : index
    %28 = vector.load %arg2[%c0_20, %c1_21, %c0_22] : memref<8x8x8xf32, #tpu.memory_space<vmem>>, vector<8x1x8xf32>
    %29 = vector.shape_cast %28 : vector<8x1x8xf32> to vector<8x8xf32>
    %c0_23 = arith.constant 0 : index
    %c1_24 = arith.constant 1 : index
    %c0_25 = arith.constant 0 : index
    %30 = vector.load %arg3[%c0_23, %c1_24, %c0_25] : memref<8x8x8xf32, #tpu.memory_space<vmem>>, vector<8x1x8xf32>
    %31 = vector.shape_cast %30 : vector<8x1x8xf32> to vector<8x8xf32>
    %cst_26 = arith.constant dense<0.000000e+00> : vector<8x8xf32>
    %32 = tpu.matmul %27, %29, %cst_26 {dimension_numbers = #tpu.dot_dimension_numbers<[1], [1], [0], [0], [0, 0, 1, 0], [], []>} : vector<8x8xf32>, vector<8x8xf32>, vector<8x8xf32> -> vector<8x8xf32>
    %cst_27 = arith.constant 0.353553385 : f32
    %33 = vector.broadcast %cst_27 : f32 to vector<8x8xf32>
    %34 = arith.mulf %32, %33 : vector<8x8xf32>
    %c1_28 = arith.constant 1 : index
    %c0_29 = arith.constant 0 : index
    %c0_30 = arith.constant 0 : index
    %35 = vector.load %arg4[%c1_28, %c0_29, %c0_30] : memref<8x8x8xf32, #tpu.memory_space<vmem>>, vector<1x8x8xf32>
    %36 = vector.shape_cast %35 : vector<1x8x8xf32> to vector<8x8xf32>
    %37 = arith.addf %34, %36 : vector<8x8xf32>
    %cst_31 = arith.constant dense<0xFF800000> : vector<8xf32>
    %38 = vector.multi_reduction <maximumf>, %37, %cst_31 [1] : vector<8x8xf32> to vector<8xf32>
    %39 = vector.shape_cast %38 : vector<8xf32> to vector<8x1xf32>
    %40 = vector.broadcast %39 : vector<8x1xf32> to vector<8x8xf32>
    %41 = arith.subf %37, %40 : vector<8x8xf32>
    %42 = math.exp %41 : vector<8x8xf32>
    %cst_32 = arith.constant dense<0.000000e+00> : vector<8xf32>
    %43 = vector.multi_reduction <add>, %42, %cst_32 [1] : vector<8x8xf32> to vector<8xf32>
    %44 = vector.shape_cast %43 : vector<8xf32> to vector<8x1xf32>
    %45 = tpu.reciprocal %44 {approx = true} : vector<8x1xf32> -> vector<8x1xf32>
    %46 = vector.broadcast %45 : vector<8x1xf32> to vector<8x8xf32>
    %47 = arith.mulf %42, %46 : vector<8x8xf32>
    %cst_33 = arith.constant dense<0.000000e+00> : vector<8x8xf32>
    %48 = tpu.matmul %47, %31, %cst_33 {dimension_numbers = #tpu.dot_dimension_numbers<[1], [0], [0], [1], [0, 0, 1, 1], [], []>} : vector<8x8xf32>, vector<8x8xf32>, vector<8x8xf32> -> vector<8x8xf32>
    %c0_34 = arith.constant 0 : index
    %c1_35 = arith.constant 1 : index
    %c0_36 = arith.constant 0 : index
    %49 = vector.load %arg5[%c0_34, %c1_35, %c0_36] : memref<8x8x8xf32, #tpu.memory_space<vmem>>, vector<8x1x8xf32>
    %50 = vector.shape_cast %49 : vector<8x1x8xf32> to vector<8x8xf32>
    %51 = vector.shape_cast %48 : vector<8x8xf32> to vector<8x1x8xf32>
    tpu.vector_store %arg5[%c0_34, %c1_35, %c0_36], %51 {strides = array<i32>} : memref<8x8x8xf32, #tpu.memory_space<vmem>>, vector<8x1x8xf32>,
    %c0_37 = arith.constant 0 : index
    %c2 = arith.constant 2 : index
    %c0_38 = arith.constant 0 : index
    %52 = vector.load %arg1[%c0_37, %c2, %c0_38] : memref<8x8x8xf32, #tpu.memory_space<vmem>>, vector<8x1x8xf32>
    %53 = vector.shape_cast %52 : vector<8x1x8xf32> to vector<8x8xf32>
    %c0_39 = arith.constant 0 : index
    %c2_40 = arith.constant 2 : index
    %c0_41 = arith.constant 0 : index
    %54 = vector.load %arg2[%c0_39, %c2_40, %c0_41] : memref<8x8x8xf32, #tpu.memory_space<vmem>>, vector<8x1x8xf32>
    %55 = vector.shape_cast %54 : vector<8x1x8xf32> to vector<8x8xf32>
    %c0_42 = arith.constant 0 : index
    %c2_43 = arith.constant 2 : index
    %c0_44 = arith.constant 0 : index
    %56 = vector.load %arg3[%c0_42, %c2_43, %c0_44] : memref<8x8x8xf32, #tpu.memory_space<vmem>>, vector<8x1x8xf32>
    %57 = vector.shape_cast %56 : vector<8x1x8xf32> to vector<8x8xf32>
    %cst_45 = arith.constant dense<0.000000e+00> : vector<8x8xf32>
    %58 = tpu.matmul %53, %55, %cst_45 {dimension_numbers = #tpu.dot_dimension_numbers<[1], [1], [0], [0], [0, 0, 1, 0], [], []>} : vector<8x8xf32>, vector<8x8xf32>, vector<8x8xf32> -> vector<8x8xf32>
    %cst_46 = arith.constant 0.353553385 : f32
    %59 = vector.broadcast %cst_46 : f32 to vector<8x8xf32>
    %60 = arith.mulf %58, %59 : vector<8x8xf32>
    %c2_47 = arith.constant 2 : index
    %c0_48 = arith.constant 0 : index
    %c0_49 = arith.constant 0 : index
    %61 = vector.load %arg4[%c2_47, %c0_48, %c0_49] : memref<8x8x8xf32, #tpu.memory_space<vmem>>, vector<1x8x8xf32>
    %62 = vector.shape_cast %61 : vector<1x8x8xf32> to vector<8x8xf32>
    %63 = arith.addf %60, %62 : vector<8x8xf32>
    %cst_50 = arith.constant dense<0xFF800000> : vector<8xf32>
    %64 = vector.multi_reduction <maximumf>, %63, %cst_50 [1] : vector<8x8xf32> to vector<8xf32>
    %65 = vector.shape_cast %64 : vector<8xf32> to vector<8x1xf32>
    %66 = vector.broadcast %65 : vector<8x1xf32> to vector<8x8xf32>
    %67 = arith.subf %63, %66 : vector<8x8xf32>
    %68 = math.exp %67 : vector<8x8xf32>
    %cst_51 = arith.constant dense<0.000000e+00> : vector<8xf32>
    %69 = vector.multi_reduction <add>, %68, %cst_51 [1] : vector<8x8xf32> to vector<8xf32>
    %70 = vector.shape_cast %69 : vector<8xf32> to vector<8x1xf32>
    %71 = tpu.reciprocal %70 {approx = true} : vector<8x1xf32> -> vector<8x1xf32>
    %72 = vector.broadcast %71 : vector<8x1xf32> to vector<8x8xf32>
    %73 = arith.mulf %68, %72 : vector<8x8xf32>
    %cst_52 = arith.constant dense<0.000000e+00> : vector<8x8xf32>
    %74 = tpu.matmul %73, %57, %cst_52 {dimension_numbers = #tpu.dot_dimension_numbers<[1], [0], [0], [1], [0, 0, 1, 1], [], []>} : vector<8x8xf32>, vector<8x8xf32>, vector<8x8xf32> -> vector<8x8xf32>
    %c0_53 = arith.constant 0 : index
    %c2_54 = arith.constant 2 : index
    %c0_55 = arith.constant 0 : index
    %75 = vector.load %arg5[%c0_53, %c2_54, %c0_55] : memref<8x8x8xf32, #tpu.memory_space<vmem>>, vector<8x1x8xf32>
    %76 = vector.shape_cast %75 : vector<8x1x8xf32> to vector<8x8xf32>
    %77 = vector.shape_cast %74 : vector<8x8xf32> to vector<8x1x8xf32>
    tpu.vector_store %arg5[%c0_53, %c2_54, %c0_55], %77 {strides = array<i32>} : memref<8x8x8xf32, #tpu.memory_space<vmem>>, vector<8x1x8xf32>,
    %c0_56 = arith.constant 0 : index
    %c3 = arith.constant 3 : index
    %c0_57 = arith.constant 0 : index
    %78 = vector.load %arg1[%c0_56, %c3, %c0_57] : memref<8x8x8xf32, #tpu.memory_space<vmem>>, vector<8x1x8xf32>
    %79 = vector.shape_cast %78 : vector<8x1x8xf32> to vector<8x8xf32>
    %c0_58 = arith.constant 0 : index
    %c3_59 = arith.constant 3 : index
    %c0_60 = arith.constant 0 : index
    %80 = vector.load %arg2[%c0_58, %c3_59, %c0_60] : memref<8x8x8xf32, #tpu.memory_space<vmem>>, vector<8x1x8xf32>
    %81 = vector.shape_cast %80 : vector<8x1x8xf32> to vector<8x8xf32>
    %c0_61 = arith.constant 0 : index
    %c3_62 = arith.constant 3 : index
    %c0_63 = arith.constant 0 : index
    %82 = vector.load %arg3[%c0_61, %c3_62, %c0_63] : memref<8x8x8xf32, #tpu.memory_space<vmem>>, vector<8x1x8xf32>
    %83 = vector.shape_cast %82 : vector<8x1x8xf32> to vector<8x8xf32>
    %cst_64 = arith.constant dense<0.000000e+00> : vector<8x8xf32>
    %84 = tpu.matmul %79, %81, %cst_64 {dimension_numbers = #tpu.dot_dimension_numbers<[1], [1], [0], [0], [0, 0, 1, 0], [], []>} : vector<8x8xf32>, vector<8x8xf32>, vector<8x8xf32> -> vector<8x8xf32>
    %cst_65 = arith.constant 0.353553385 : f32
    %85 = vector.broadcast %cst_65 : f32 to vector<8x8xf32>
    %86 = arith.mulf %84, %85 : vector<8x8xf32>
    %c3_66 = arith.constant 3 : index
    %c0_67 = arith.constant 0 : index
    %c0_68 = arith.constant 0 : index
    %87 = vector.load %arg4[%c3_66, %c0_67, %c0_68] : memref<8x8x8xf32, #tpu.memory_space<vmem>>, vector<1x8x8xf32>
    %88 = vector.shape_cast %87 : vector<1x8x8xf32> to vector<8x8xf32>
    %89 = arith.addf %86, %88 : vector<8x8xf32>
    %cst_69 = arith.constant dense<0xFF800000> : vector<8xf32>
    %90 = vector.multi_reduction <maximumf>, %89, %cst_69 [1] : vector<8x8xf32> to vector<8xf32>
    %91 = vector.shape_cast %90 : vector<8xf32> to vector<8x1xf32>
    %92 = vector.broadcast %91 : vector<8x1xf32> to vector<8x8xf32>
    %93 = arith.subf %89, %92 : vector<8x8xf32>
    %94 = math.exp %93 : vector<8x8xf32>
    %cst_70 = arith.constant dense<0.000000e+00> : vector<8xf32>
    %95 = vector.multi_reduction <add>, %94, %cst_70 [1] : vector<8x8xf32> to vector<8xf32>
    %96 = vector.shape_cast %95 : vector<8xf32> to vector<8x1xf32>
    %97 = tpu.reciprocal %96 {approx = true} : vector<8x1xf32> -> vector<8x1xf32>
    %98 = vector.broadcast %97 : vector<8x1xf32> to vector<8x8xf32>
    %99 = arith.mulf %94, %98 : vector<8x8xf32>
    %cst_71 = arith.constant dense<0.000000e+00> : vector<8x8xf32>
    %100 = tpu.matmul %99, %83, %cst_71 {dimension_numbers = #tpu.dot_dimension_numbers<[1], [0], [0], [1], [0, 0, 1, 1], [], []>} : vector<8x8xf32>, vector<8x8xf32>, vector<8x8xf32> -> vector<8x8xf32>
    %c0_72 = arith.constant 0 : index
    %c3_73 = arith.constant 3 : index
    %c0_74 = arith.constant 0 : index
    %101 = vector.load %arg5[%c0_72, %c3_73, %c0_74] : memref<8x8x8xf32, #tpu.memory_space<vmem>>, vector<8x1x8xf32>
    %102 = vector.shape_cast %101 : vector<8x1x8xf32> to vector<8x8xf32>
    %103 = vector.shape_cast %100 : vector<8x8xf32> to vector<8x1x8xf32>
    tpu.vector_store %arg5[%c0_72, %c3_73, %c0_74], %103 {strides = array<i32>} : memref<8x8x8xf32, #tpu.memory_space<vmem>>, vector<8x1x8xf32>,
    %c0_75 = arith.constant 0 : index
    %c4 = arith.constant 4 : index
    %c0_76 = arith.constant 0 : index
    %104 = vector.load %arg1[%c0_75, %c4, %c0_76] : memref<8x8x8xf32, #tpu.memory_space<vmem>>, vector<8x1x8xf32>
    %105 = vector.shape_cast %104 : vector<8x1x8xf32> to vector<8x8xf32>
    %c0_77 = arith.constant 0 : index
    %c4_78 = arith.constant 4 : index
    %c0_79 = arith.constant 0 : index
    %106 = vector.load %arg2[%c0_77, %c4_78, %c0_79] : memref<8x8x8xf32, #tpu.memory_space<vmem>>, vector<8x1x8xf32>
    %107 = vector.shape_cast %106 : vector<8x1x8xf32> to vector<8x8xf32>
    %c0_80 = arith.constant 0 : index
    %c4_81 = arith.constant 4 : index
    %c0_82 = arith.constant 0 : index
    %108 = vector.load %arg3[%c0_80, %c4_81, %c0_82] : memref<8x8x8xf32, #tpu.memory_space<vmem>>, vector<8x1x8xf32>
    %109 = vector.shape_cast %108 : vector<8x1x8xf32> to vector<8x8xf32>
    %cst_83 = arith.constant dense<0.000000e+00> : vector<8x8xf32>
    %110 = tpu.matmul %105, %107, %cst_83 {dimension_numbers = #tpu.dot_dimension_numbers<[1], [1], [0], [0], [0, 0, 1, 0], [], []>} : vector<8x8xf32>, vector<8x8xf32>, vector<8x8xf32> -> vector<8x8xf32>
    %cst_84 = arith.constant 0.353553385 : f32
    %111 = vector.broadcast %cst_84 : f32 to vector<8x8xf32>
    %112 = arith.mulf %110, %111 : vector<8x8xf32>
    %c4_85 = arith.constant 4 : index
    %c0_86 = arith.constant 0 : index
    %c0_87 = arith.constant 0 : index
    %113 = vector.load %arg4[%c4_85, %c0_86, %c0_87] : memref<8x8x8xf32, #tpu.memory_space<vmem>>, vector<1x8x8xf32>
    %114 = vector.shape_cast %113 : vector<1x8x8xf32> to vector<8x8xf32>
    %115 = arith.addf %112, %114 : vector<8x8xf32>
    %cst_88 = arith.constant dense<0xFF800000> : vector<8xf32>
    %116 = vector.multi_reduction <maximumf>, %115, %cst_88 [1] : vector<8x8xf32> to vector<8xf32>
    %117 = vector.shape_cast %116 : vector<8xf32> to vector<8x1xf32>
    %118 = vector.broadcast %117 : vector<8x1xf32> to vector<8x8xf32>
    %119 = arith.subf %115, %118 : vector<8x8xf32>
    %120 = math.exp %119 : vector<8x8xf32>
    %cst_89 = arith.constant dense<0.000000e+00> : vector<8xf32>
    %121 = vector.multi_reduction <add>, %120, %cst_89 [1] : vector<8x8xf32> to vector<8xf32>
    %122 = vector.shape_cast %121 : vector<8xf32> to vector<8x1xf32>
    %123 = tpu.reciprocal %122 {approx = true} : vector<8x1xf32> -> vector<8x1xf32>
    %124 = vector.broadcast %123 : vector<8x1xf32> to vector<8x8xf32>
    %125 = arith.mulf %120, %124 : vector<8x8xf32>
    %cst_90 = arith.constant dense<0.000000e+00> : vector<8x8xf32>
    %126 = tpu.matmul %125, %109, %cst_90 {dimension_numbers = #tpu.dot_dimension_numbers<[1], [0], [0], [1], [0, 0, 1, 1], [], []>} : vector<8x8xf32>, vector<8x8xf32>, vector<8x8xf32> -> vector<8x8xf32>
    %c0_91 = arith.constant 0 : index
    %c4_92 = arith.constant 4 : index
    %c0_93 = arith.constant 0 : index
    %127 = vector.load %arg5[%c0_91, %c4_92, %c0_93] : memref<8x8x8xf32, #tpu.memory_space<vmem>>, vector<8x1x8xf32>
    %128 = vector.shape_cast %127 : vector<8x1x8xf32> to vector<8x8xf32>
    %129 = vector.shape_cast %126 : vector<8x8xf32> to vector<8x1x8xf32>
    tpu.vector_store %arg5[%c0_91, %c4_92, %c0_93], %129 {strides = array<i32>} : memref<8x8x8xf32, #tpu.memory_space<vmem>>, vector<8x1x8xf32>,
    %c0_94 = arith.constant 0 : index
    %c5 = arith.constant 5 : index
    %c0_95 = arith.constant 0 : index
    %130 = vector.load %arg1[%c0_94, %c5, %c0_95] : memref<8x8x8xf32, #tpu.memory_space<vmem>>, vector<8x1x8xf32>
    %131 = vector.shape_cast %130 : vector<8x1x8xf32> to vector<8x8xf32>
    %c0_96 = arith.constant 0 : index
    %c5_97 = arith.constant 5 : index
    %c0_98 = arith.constant 0 : index
    %132 = vector.load %arg2[%c0_96, %c5_97, %c0_98] : memref<8x8x8xf32, #tpu.memory_space<vmem>>, vector<8x1x8xf32>
    %133 = vector.shape_cast %132 : vector<8x1x8xf32> to vector<8x8xf32>
    %c0_99 = arith.constant 0 : index
    %c5_100 = arith.constant 5 : index
    %c0_101 = arith.constant 0 : index
    %134 = vector.load %arg3[%c0_99, %c5_100, %c0_101] : memref<8x8x8xf32, #tpu.memory_space<vmem>>, vector<8x1x8xf32>
    %135 = vector.shape_cast %134 : vector<8x1x8xf32> to vector<8x8xf32>
    %cst_102 = arith.constant dense<0.000000e+00> : vector<8x8xf32>
    %136 = tpu.matmul %131, %133, %cst_102 {dimension_numbers = #tpu.dot_dimension_numbers<[1], [1], [0], [0], [0, 0, 1, 0], [], []>} : vector<8x8xf32>, vector<8x8xf32>, vector<8x8xf32> -> vector<8x8xf32>
    %cst_103 = arith.constant 0.353553385 : f32
    %137 = vector.broadcast %cst_103 : f32 to vector<8x8xf32>
    %138 = arith.mulf %136, %137 : vector<8x8xf32>
    %c5_104 = arith.constant 5 : index
    %c0_105 = arith.constant 0 : index
    %c0_106 = arith.constant 0 : index
    %139 = vector.load %arg4[%c5_104, %c0_105, %c0_106] : memref<8x8x8xf32, #tpu.memory_space<vmem>>, vector<1x8x8xf32>
    %140 = vector.shape_cast %139 : vector<1x8x8xf32> to vector<8x8xf32>
    %141 = arith.addf %138, %140 : vector<8x8xf32>
    %cst_107 = arith.constant dense<0xFF800000> : vector<8xf32>
    %142 = vector.multi_reduction <maximumf>, %141, %cst_107 [1] : vector<8x8xf32> to vector<8xf32>
    %143 = vector.shape_cast %142 : vector<8xf32> to vector<8x1xf32>
    %144 = vector.broadcast %143 : vector<8x1xf32> to vector<8x8xf32>
    %145 = arith.subf %141, %144 : vector<8x8xf32>
    %146 = math.exp %145 : vector<8x8xf32>
    %cst_108 = arith.constant dense<0.000000e+00> : vector<8xf32>
    %147 = vector.multi_reduction <add>, %146, %cst_108 [1] : vector<8x8xf32> to vector<8xf32>
    %148 = vector.shape_cast %147 : vector<8xf32> to vector<8x1xf32>
    %149 = tpu.reciprocal %148 {approx = true} : vector<8x1xf32> -> vector<8x1xf32>
    %150 = vector.broadcast %149 : vector<8x1xf32> to vector<8x8xf32>
    %151 = arith.mulf %146, %150 : vector<8x8xf32>
    %cst_109 = arith.constant dense<0.000000e+00> : vector<8x8xf32>
    %152 = tpu.matmul %151, %135, %cst_109 {dimension_numbers = #tpu.dot_dimension_numbers<[1], [0], [0], [1], [0, 0, 1, 1], [], []>} : vector<8x8xf32>, vector<8x8xf32>, vector<8x8xf32> -> vector<8x8xf32>
    %c0_110 = arith.constant 0 : index
    %c5_111 = arith.constant 5 : index
    %c0_112 = arith.constant 0 : index
    %153 = vector.load %arg5[%c0_110, %c5_111, %c0_112] : memref<8x8x8xf32, #tpu.memory_space<vmem>>, vector<8x1x8xf32>
    %154 = vector.shape_cast %153 : vector<8x1x8xf32> to vector<8x8xf32>
    %155 = vector.shape_cast %152 : vector<8x8xf32> to vector<8x1x8xf32>
    tpu.vector_store %arg5[%c0_110, %c5_111, %c0_112], %155 {strides = array<i32>} : memref<8x8x8xf32, #tpu.memory_space<vmem>>, vector<8x1x8xf32>,
    %c0_113 = arith.constant 0 : index
    %c6 = arith.constant 6 : index
    %c0_114 = arith.constant 0 : index
    %156 = vector.load %arg1[%c0_113, %c6, %c0_114] : memref<8x8x8xf32, #tpu.memory_space<vmem>>, vector<8x1x8xf32>
    %157 = vector.shape_cast %156 : vector<8x1x8xf32> to vector<8x8xf32>
    %c0_115 = arith.constant 0 : index
    %c6_116 = arith.constant 6 : index
    %c0_117 = arith.constant 0 : index
    %158 = vector.load %arg2[%c0_115, %c6_116, %c0_117] : memref<8x8x8xf32, #tpu.memory_space<vmem>>, vector<8x1x8xf32>
    %159 = vector.shape_cast %158 : vector<8x1x8xf32> to vector<8x8xf32>
    %c0_118 = arith.constant 0 : index
    %c6_119 = arith.constant 6 : index
    %c0_120 = arith.constant 0 : index
    %160 = vector.load %arg3[%c0_118, %c6_119, %c0_120] : memref<8x8x8xf32, #tpu.memory_space<vmem>>, vector<8x1x8xf32>
    %161 = vector.shape_cast %160 : vector<8x1x8xf32> to vector<8x8xf32>
    %cst_121 = arith.constant dense<0.000000e+00> : vector<8x8xf32>
    %162 = tpu.matmul %157, %159, %cst_121 {dimension_numbers = #tpu.dot_dimension_numbers<[1], [1], [0], [0], [0, 0, 1, 0], [], []>} : vector<8x8xf32>, vector<8x8xf32>, vector<8x8xf32> -> vector<8x8xf32>
    %cst_122 = arith.constant 0.353553385 : f32
    %163 = vector.broadcast %cst_122 : f32 to vector<8x8xf32>
    %164 = arith.mulf %162, %163 : vector<8x8xf32>
    %c6_123 = arith.constant 6 : index
    %c0_124 = arith.constant 0 : index
    %c0_125 = arith.constant 0 : index
    %165 = vector.load %arg4[%c6_123, %c0_124, %c0_125] : memref<8x8x8xf32, #tpu.memory_space<vmem>>, vector<1x8x8xf32>
    %166 = vector.shape_cast %165 : vector<1x8x8xf32> to vector<8x8xf32>
    %167 = arith.addf %164, %166 : vector<8x8xf32>
    %cst_126 = arith.constant dense<0xFF800000> : vector<8xf32>
    %168 = vector.multi_reduction <maximumf>, %167, %cst_126 [1] : vector<8x8xf32> to vector<8xf32>
    %169 = vector.shape_cast %168 : vector<8xf32> to vector<8x1xf32>
    %170 = vector.broadcast %169 : vector<8x1xf32> to vector<8x8xf32>
    %171 = arith.subf %167, %170 : vector<8x8xf32>
    %172 = math.exp %171 : vector<8x8xf32>
    %cst_127 = arith.constant dense<0.000000e+00> : vector<8xf32>
    %173 = vector.multi_reduction <add>, %172, %cst_127 [1] : vector<8x8xf32> to vector<8xf32>
    %174 = vector.shape_cast %173 : vector<8xf32> to vector<8x1xf32>
    %175 = tpu.reciprocal %174 {approx = true} : vector<8x1xf32> -> vector<8x1xf32>
    %176 = vector.broadcast %175 : vector<8x1xf32> to vector<8x8xf32>
    %177 = arith.mulf %172, %176 : vector<8x8xf32>
    %cst_128 = arith.constant dense<0.000000e+00> : vector<8x8xf32>
    %178 = tpu.matmul %177, %161, %cst_128 {dimension_numbers = #tpu.dot_dimension_numbers<[1], [0], [0], [1], [0, 0, 1, 1], [], []>} : vector<8x8xf32>, vector<8x8xf32>, vector<8x8xf32> -> vector<8x8xf32>
    %c0_129 = arith.constant 0 : index
    %c6_130 = arith.constant 6 : index
    %c0_131 = arith.constant 0 : index
    %179 = vector.load %arg5[%c0_129, %c6_130, %c0_131] : memref<8x8x8xf32, #tpu.memory_space<vmem>>, vector<8x1x8xf32>
    %180 = vector.shape_cast %179 : vector<8x1x8xf32> to vector<8x8xf32>
    %181 = vector.shape_cast %178 : vector<8x8xf32> to vector<8x1x8xf32>
    tpu.vector_store %arg5[%c0_129, %c6_130, %c0_131], %181 {strides = array<i32>} : memref<8x8x8xf32, #tpu.memory_space<vmem>>, vector<8x1x8xf32>,
    %c0_132 = arith.constant 0 : index
    %c7 = arith.constant 7 : index
    %c0_133 = arith.constant 0 : index
    %182 = vector.load %arg1[%c0_132, %c7, %c0_133] : memref<8x8x8xf32, #tpu.memory_space<vmem>>, vector<8x1x8xf32>
    %183 = vector.shape_cast %182 : vector<8x1x8xf32> to vector<8x8xf32>
    %c0_134 = arith.constant 0 : index
    %c7_135 = arith.constant 7 : index
    %c0_136 = arith.constant 0 : index
    %184 = vector.load %arg2[%c0_134, %c7_135, %c0_136] : memref<8x8x8xf32, #tpu.memory_space<vmem>>, vector<8x1x8xf32>
    %185 = vector.shape_cast %184 : vector<8x1x8xf32> to vector<8x8xf32>
    %c0_137 = arith.constant 0 : index
    %c7_138 = arith.constant 7 : index
    %c0_139 = arith.constant 0 : index
    %186 = vector.load %arg3[%c0_137, %c7_138, %c0_139] : memref<8x8x8xf32, #tpu.memory_space<vmem>>, vector<8x1x8xf32>
    %187 = vector.shape_cast %186 : vector<8x1x8xf32> to vector<8x8xf32>
    %cst_140 = arith.constant dense<0.000000e+00> : vector<8x8xf32>
    %188 = tpu.matmul %183, %185, %cst_140 {dimension_numbers = #tpu.dot_dimension_numbers<[1], [1], [0], [0], [0, 0, 1, 0], [], []>} : vector<8x8xf32>, vector<8x8xf32>, vector<8x8xf32> -> vector<8x8xf32>
    %cst_141 = arith.constant 0.353553385 : f32
    %189 = vector.broadcast %cst_141 : f32 to vector<8x8xf32>
    %190 = arith.mulf %188, %189 : vector<8x8xf32>
    %c7_142 = arith.constant 7 : index
    %c0_143 = arith.constant 0 : index
    %c0_144 = arith.constant 0 : index
    %191 = vector.load %arg4[%c7_142, %c0_143, %c0_144] : memref<8x8x8xf32, #tpu.memory_space<vmem>>, vector<1x8x8xf32>
    %192 = vector.shape_cast %191 : vector<1x8x8xf32> to vector<8x8xf32>
    %193 = arith.addf %190, %192 : vector<8x8xf32>
    %cst_145 = arith.constant dense<0xFF800000> : vector<8xf32>
    %194 = vector.multi_reduction <maximumf>, %193, %cst_145 [1] : vector<8x8xf32> to vector<8xf32>
    %195 = vector.shape_cast %194 : vector<8xf32> to vector<8x1xf32>
    %196 = vector.broadcast %195 : vector<8x1xf32> to vector<8x8xf32>
    %197 = arith.subf %193, %196 : vector<8x8xf32>
    %198 = math.exp %197 : vector<8x8xf32>
    %cst_146 = arith.constant dense<0.000000e+00> : vector<8xf32>
    %199 = vector.multi_reduction <add>, %198, %cst_146 [1] : vector<8x8xf32> to vector<8xf32>
    %200 = vector.shape_cast %199 : vector<8xf32> to vector<8x1xf32>
    %201 = tpu.reciprocal %200 {approx = true} : vector<8x1xf32> -> vector<8x1xf32>
    %202 = vector.broadcast %201 : vector<8x1xf32> to vector<8x8xf32>
    %203 = arith.mulf %198, %202 : vector<8x8xf32>
    %cst_147 = arith.constant dense<0.000000e+00> : vector<8x8xf32>
    %204 = tpu.matmul %203, %187, %cst_147 {dimension_numbers = #tpu.dot_dimension_numbers<[1], [0], [0], [1], [0, 0, 1, 1], [], []>} : vector<8x8xf32>, vector<8x8xf32>, vector<8x8xf32> -> vector<8x8xf32>
    %c0_148 = arith.constant 0 : index
    %c7_149 = arith.constant 7 : index
    %c0_150 = arith.constant 0 : index
    %205 = vector.load %arg5[%c0_148, %c7_149, %c0_150] : memref<8x8x8xf32, #tpu.memory_space<vmem>>, vector<8x1x8xf32>
    %206 = vector.shape_cast %205 : vector<8x1x8xf32> to vector<8x8xf32>
    %207 = vector.shape_cast %204 : vector<8x8xf32> to vector<8x1x8xf32>
    tpu.vector_store %arg5[%c0_148, %c7_149, %c0_150], %207 {strides = array<i32>} : memref<8x8x8xf32, #tpu.memory_space<vmem>>, vector<8x1x8xf32>,
    return
  }
  func.func @transform_0(%arg0: i32) -> (i32, i32, i32) {
    %c0_i32 = arith.constant 0 : i32
    %c0_i32_0 = arith.constant 0 : i32
    %c0_i32_1 = arith.constant 0 : i32
    return %c0_i32, %arg0, %c0_i32_0 : i32, i32, i32
  }
  func.func @transform_1(%arg0: i32) -> (i32, i32, i32) {
    %c0_i32 = arith.constant 0 : i32
    %c0_i32_0 = arith.constant 0 : i32
    %c0_i32_1 = arith.constant 0 : i32
    return %c0_i32, %arg0, %c0_i32_0 : i32, i32, i32
  }
  func.func @transform_2(%arg0: i32) -> (i32, i32, i32) {
    %c0_i32 = arith.constant 0 : i32
    %c0_i32_0 = arith.constant 0 : i32
    %c0_i32_1 = arith.constant 0 : i32
    return %c0_i32, %arg0, %c0_i32_0 : i32, i32, i32
  }
  func.func @transform_3(%arg0: i32) -> (i32, i32, i32) {
    %c0_i32 = arith.constant 0 : i32
    %c0_i32_0 = arith.constant 0 : i32
    %c0_i32_1 = arith.constant 0 : i32
    return %arg0, %c0_i32, %c0_i32_0 : i32, i32, i32
  }
  func.func @transform_4(%arg0: i32) -> (i32, i32, i32) {
    %c0_i32 = arith.constant 0 : i32
    %c0_i32_0 = arith.constant 0 : i32
    %c0_i32_1 = arith.constant 0 : i32
    return %c0_i32, %arg0, %c0_i32_0 : i32, i32, i32
  }
}

module attributes {stable_mosaic.version = 11 : i64} {
  func.func @_ffn_kernel(%arg0: i32, %arg1: i32, %arg2: memref<16x32xf32, #tpu.memory_space<vmem>>, %arg3: memref<32x64xf32, #tpu.memory_space<vmem>>, %arg4: memref<1x64xf32, #tpu.memory_space<vmem>>, %arg5: memref<64x32xf32, #tpu.memory_space<vmem>>, %arg6: memref<1x32xf32, #tpu.memory_space<vmem>>, %arg7: memref<1x32xf32, #tpu.memory_space<vmem>>, %arg8: memref<1x32xf32, #tpu.memory_space<vmem>>, %arg9: memref<16x32xf32, #tpu.memory_space<vmem>>, %arg10: memref<16x32xf32, #tpu.memory_space<vmem>>) attributes {dimension_semantics = [#tpu.dimension_semantics<parallel>, #tpu.dimension_semantics<arbitrary>], iteration_bounds = array<i64: 1, 1>, scalar_prefetch = 0 : i64, scratch_operands = 1 : i64, tpu.core_type = #tpu.core_type<tc>, window_params = [{transform_indices = @transform_0, window_bounds = array<i64: 16, 32>}, {transform_indices = @transform_1, window_bounds = array<i64: 32, 64>}, {transform_indices = @transform_2, window_bounds = array<i64: 1, 64>}, {transform_indices = @transform_3, window_bounds = array<i64: 64, 32>}, {pipeline_mode = #tpu.pipeline_mode<synchronous>, transform_indices = @transform_4, window_bounds = array<i64: 1, 32>}, {pipeline_mode = #tpu.pipeline_mode<synchronous>, transform_indices = @transform_5, window_bounds = array<i64: 1, 32>}, {pipeline_mode = #tpu.pipeline_mode<synchronous>, transform_indices = @transform_6, window_bounds = array<i64: 1, 32>}, {transform_indices = @transform_7, window_bounds = array<i64: 16, 32>}]} {
    %c0_i32 = arith.constant 0 : i32
    %0 = arith.cmpi eq, %arg1, %c0_i32 : i32
    %1 = arith.extui %0 : i1 to i32
    %c0_i32_0 = arith.constant 0 : i32
    %2 = arith.cmpi ne, %1, %c0_i32_0 : i32
    scf.if %2 {
      %cst_16 = arith.constant 0.000000e+00 : f32
      %19 = vector.broadcast %cst_16 : f32 to vector<16x32xf32>
      %c0_17 = arith.constant 0 : index
      %c0_18 = arith.constant 0 : index
      %20 = vector.load %arg10[%c0_17, %c0_18] : memref<16x32xf32, #tpu.memory_space<vmem>>, vector<16x32xf32>
      tpu.vector_store %arg10[%c0_17, %c0_18], %19 {strides = array<i32>} : memref<16x32xf32, #tpu.memory_space<vmem>>, vector<16x32xf32>,
    } else {
    }
    %c0 = arith.constant 0 : index
    %c0_1 = arith.constant 0 : index
    %3 = vector.load %arg2[%c0, %c0_1] : memref<16x32xf32, #tpu.memory_space<vmem>>, vector<16x32xf32>
    %c0_2 = arith.constant 0 : index
    %c0_3 = arith.constant 0 : index
    %4 = vector.load %arg3[%c0_2, %c0_3] : memref<32x64xf32, #tpu.memory_space<vmem>>, vector<32x64xf32>
    %cst = arith.constant dense<0.000000e+00> : vector<16x64xf32>
    %5 = tpu.matmul %3, %4, %cst {dimension_numbers = #tpu.dot_dimension_numbers<[1], [0], [0], [1], [0, 0, 1, 1], [], []>} : vector<16x32xf32>, vector<32x64xf32>, vector<16x64xf32> -> vector<16x64xf32>
    %c0_4 = arith.constant 0 : index
    %c0_5 = arith.constant 0 : index
    %6 = vector.load %arg4[%c0_4, %c0_5] : memref<1x64xf32, #tpu.memory_space<vmem>>, vector<1x64xf32>
    %7 = vector.broadcast %6 : vector<1x64xf32> to vector<16x64xf32>
    %8 = arith.addf %5, %7 : vector<16x64xf32>
    %cst_6 = arith.constant 0.000000e+00 : f32
    %9 = vector.broadcast %cst_6 : f32 to vector<16x64xf32>
    %10 = arith.maximumf %8, %9 : vector<16x64xf32>
    %c0_7 = arith.constant 0 : index
    %c0_8 = arith.constant 0 : index
    %11 = vector.load %arg10[%c0_7, %c0_8] : memref<16x32xf32, #tpu.memory_space<vmem>>, vector<16x32xf32>
    %c0_9 = arith.constant 0 : index
    %c0_10 = arith.constant 0 : index
    %12 = vector.load %arg5[%c0_9, %c0_10] : memref<64x32xf32, #tpu.memory_space<vmem>>, vector<64x32xf32>
    %cst_11 = arith.constant dense<0.000000e+00> : vector<16x32xf32>
    %13 = tpu.matmul %10, %12, %cst_11 {dimension_numbers = #tpu.dot_dimension_numbers<[1], [0], [0], [1], [0, 0, 1, 1], [], []>} : vector<16x64xf32>, vector<64x32xf32>, vector<16x32xf32> -> vector<16x32xf32>
    %14 = arith.addf %11, %13 : vector<16x32xf32>
    %c0_12 = arith.constant 0 : index
    %c0_13 = arith.constant 0 : index
    %15 = vector.load %arg10[%c0_12, %c0_13] : memref<16x32xf32, #tpu.memory_space<vmem>>, vector<16x32xf32>
    tpu.vector_store %arg10[%c0_12, %c0_13], %14 {strides = array<i32>} : memref<16x32xf32, #tpu.memory_space<vmem>>, vector<16x32xf32>,
    %c0_i32_14 = arith.constant 0 : i32
    %16 = arith.cmpi eq, %arg1, %c0_i32_14 : i32
    %17 = arith.extui %16 : i1 to i32
    %c0_i32_15 = arith.constant 0 : i32
    %18 = arith.cmpi ne, %17, %c0_i32_15 : i32
    scf.if %18 {
      %c0_16 = arith.constant 0 : index
      %c0_17 = arith.constant 0 : index
      %19 = vector.load %arg10[%c0_16, %c0_17] : memref<16x32xf32, #tpu.memory_space<vmem>>, vector<16x32xf32>
      %c0_18 = arith.constant 0 : index
      %c0_19 = arith.constant 0 : index
      %20 = vector.load %arg6[%c0_18, %c0_19] : memref<1x32xf32, #tpu.memory_space<vmem>>, vector<1x32xf32>
      %21 = vector.broadcast %20 : vector<1x32xf32> to vector<16x32xf32>
      %22 = arith.addf %19, %21 : vector<16x32xf32>
      %c0_20 = arith.constant 0 : index
      %c0_21 = arith.constant 0 : index
      %23 = vector.load %arg2[%c0_20, %c0_21] : memref<16x32xf32, #tpu.memory_space<vmem>>, vector<16x32xf32>
      %24 = arith.addf %22, %23 : vector<16x32xf32>
      %c0_22 = arith.constant 0 : index
      %c0_23 = arith.constant 0 : index
      %25 = vector.load %arg7[%c0_22, %c0_23] : memref<1x32xf32, #tpu.memory_space<vmem>>, vector<1x32xf32>
      %c0_24 = arith.constant 0 : index
      %c0_25 = arith.constant 0 : index
      %26 = vector.load %arg8[%c0_24, %c0_25] : memref<1x32xf32, #tpu.memory_space<vmem>>, vector<1x32xf32>
      %cst_26 = arith.constant dense<0.000000e+00> : vector<16xf32>
      %27 = vector.multi_reduction <add>, %24, %cst_26 [1] : vector<16x32xf32> to vector<16xf32>
      %28 = vector.shape_cast %27 : vector<16xf32> to vector<16x1xf32>
      %cst_27 = arith.constant 3.200000e+01 : f32
      %29 = vector.broadcast %cst_27 : f32 to vector<16x1xf32>
      %30 = arith.divf %28, %29 : vector<16x1xf32>
      %31 = vector.broadcast %30 : vector<16x1xf32> to vector<16x32xf32>
      %32 = arith.subf %24, %31 : vector<16x32xf32>
      %33 = arith.mulf %32, %32 : vector<16x32xf32>
      %cst_28 = arith.constant dense<0.000000e+00> : vector<16xf32>
      %34 = vector.multi_reduction <add>, %33, %cst_28 [1] : vector<16x32xf32> to vector<16xf32>
      %35 = vector.shape_cast %34 : vector<16xf32> to vector<16x1xf32>
      %cst_29 = arith.constant 3.200000e+01 : f32
      %36 = vector.broadcast %cst_29 : f32 to vector<16x1xf32>
      %37 = arith.divf %35, %36 : vector<16x1xf32>
      %38 = vector.broadcast %30 : vector<16x1xf32> to vector<16x32xf32>
      %39 = arith.subf %24, %38 : vector<16x32xf32>
      %cst_30 = arith.constant 9.99999974E-6 : f32
      %40 = vector.broadcast %cst_30 : f32 to vector<16x1xf32>
      %41 = arith.addf %37, %40 : vector<16x1xf32>
      %42 = math.rsqrt %41 : vector<16x1xf32>
      %43 = vector.broadcast %42 : vector<16x1xf32> to vector<16x32xf32>
      %44 = arith.mulf %39, %43 : vector<16x32xf32>
      %45 = vector.broadcast %25 : vector<1x32xf32> to vector<16x32xf32>
      %46 = arith.mulf %44, %45 : vector<16x32xf32>
      %47 = vector.broadcast %26 : vector<1x32xf32> to vector<16x32xf32>
      %48 = arith.addf %46, %47 : vector<16x32xf32>
      %c0_31 = arith.constant 0 : index
      %c0_32 = arith.constant 0 : index
      %49 = vector.load %arg9[%c0_31, %c0_32] : memref<16x32xf32, #tpu.memory_space<vmem>>, vector<16x32xf32>
      tpu.vector_store %arg9[%c0_31, %c0_32], %48 {strides = array<i32>} : memref<16x32xf32, #tpu.memory_space<vmem>>, vector<16x32xf32>,
    } else {
    }
    return
  }
  func.func @transform_0(%arg0: i32, %arg1: i32) -> (i32, i32) {
    %c0_i32 = arith.constant 0 : i32
    %c0_i32_0 = arith.constant 0 : i32
    return %arg0, %c0_i32 : i32, i32
  }
  func.func @transform_1(%arg0: i32, %arg1: i32) -> (i32, i32) {
    %c0_i32 = arith.constant 0 : i32
    %c0_i32_0 = arith.constant 0 : i32
    return %c0_i32, %arg1 : i32, i32
  }
  func.func @transform_2(%arg0: i32, %arg1: i32) -> (i32, i32) {
    %c0_i32 = arith.constant 0 : i32
    %c0_i32_0 = arith.constant 0 : i32
    return %c0_i32, %arg1 : i32, i32
  }
  func.func @transform_3(%arg0: i32, %arg1: i32) -> (i32, i32) {
    %c0_i32 = arith.constant 0 : i32
    %c0_i32_0 = arith.constant 0 : i32
    return %arg1, %c0_i32 : i32, i32
  }
  func.func @transform_4(%arg0: i32, %arg1: i32) -> (i32, i32) {
    %c0_i32 = arith.constant 0 : i32
    %c0_i32_0 = arith.constant 0 : i32
    %c0_i32_1 = arith.constant 0 : i32
    return %c0_i32, %c0_i32_0 : i32, i32
  }
  func.func @transform_5(%arg0: i32, %arg1: i32) -> (i32, i32) {
    %c0_i32 = arith.constant 0 : i32
    %c0_i32_0 = arith.constant 0 : i32
    %c0_i32_1 = arith.constant 0 : i32
    return %c0_i32, %c0_i32_0 : i32, i32
  }
  func.func @transform_6(%arg0: i32, %arg1: i32) -> (i32, i32) {
    %c0_i32 = arith.constant 0 : i32
    %c0_i32_0 = arith.constant 0 : i32
    %c0_i32_1 = arith.constant 0 : i32
    return %c0_i32, %c0_i32_0 : i32, i32
  }
  func.func @transform_7(%arg0: i32, %arg1: i32) -> (i32, i32) {
    %c0_i32 = arith.constant 0 : i32
    %c0_i32_0 = arith.constant 0 : i32
    return %arg0, %c0_i32 : i32, i32
  }
}

</mosaic_0001>

<bundles_post_ra>
// kernel: graphormer_encoder_layer.4
= control target key start
LH: loop header
LB: loop body
LE: loop exit
PB: predicated region body
PF: predicated region fallthrough
CT: control target
= control target key end

     0   :  { %vm27_vm0 = vcmask 261120   ;;  %s275_s1 = inlined_call_operand.vmem [shape: f32[3,32,32], index: 1, kind: input, shape index: {}]   ;;  %s276_s0 = inlined_call_operand.vmem [shape: f32[16,32], index: 0, kind: input, shape index: {}]   ;;  %s277_s2 = inlined_call_operand.vmem [shape: f32[3,1,32], index: 2, kind: input, shape index: {}]   ;;  %s278_s4 = inlined_call_operand.vmem [shape: f32[16,32], index: 4, kind: output, shape index: {1}]   ;;  %s279_s3 = inlined_call_operand.vmem [shape: f32[16,32], index: 3, kind: output, shape index: {0}]   ;;  %s280_s5 = inlined_call_operand.vmem [shape: f32[16,32], index: 5, kind: output, shape index: {2}]  }
   0x1   :  { %v153_v0 = vld [vmem:[%s275_s1 + $0x58] sm:$0xff]  ;;  %v152_v1 = vld [vmem:[%s275_s1 + $0x50] sm:$0xff]  ;;  %v151_v2 = vld [vmem:[%s275_s1 + $0x48] sm:$0xff] }
   0x2   :  { %116 = vmatpush.msra.mxu2 %v153_v0  ;;  %v146_v3 = vld [vmem:[%s275_s1 + $0x38] sm:$0xff]  ;;  %v145_v5 = vld [vmem:[%s275_s1 + $0x30] sm:$0xff]  ;;  %v150_v7 = vld [vmem:[%s275_s1 + $0x40] sm:$0xff] }
   0x3   :  { %81 = vmatpush.msra.mxu1 %v146_v3  ;;  %v22_v4 = vld [vmem:[%s275_s1 + $0x18] sm:$0xff]  ;;  %v21_v6 = vld [vmem:[%s275_s1 + $0x10] sm:$0xff]  ;;  %v144_v8 = vld [vmem:[%s275_s1 + $0x28] sm:$0xff] }
   0x4   :  { %117 = vmatpush.msra.mxu2 %v152_v1  ;;  %157 = vmatpush.msra.mxu3 %v22_v4  ;;  %v17_v9 = vld [vmem:[%s276_s0] sm:$0xff]  ;;  %v20_v10 = vld [vmem:[%s275_s1 + $0x8] sm:$0xff] }
   0x5   :  { %82 = vmatpush.msra.mxu1 %v145_v5  ;;  %46 = vmatpush.msra.mxu0 %v22_v4  ;;  %v143_v11 = vld [vmem:[%s275_s1 + $0x20] sm:$0xff]  ;;  %v18_v13 = vld [vmem:[%s276_s0 + $0x8] sm:$0xff] }
   0x6   :  { %118 = vmatpush.msra.mxu2 %v151_v2  ;;  %158 = vmatpush.msra.mxu3 %v21_v6  ;;  %v19_v12 = vld [vmem:[%s275_s1] sm:$0xff] }
   0x7   :  { %83 = vmatpush.msra.mxu1 %v144_v8  ;;  %47 = vmatpush.msra.mxu0 %v21_v6  ;;  %v161_v14 = vld [vmem:[%s277_s2 + $0x1] ss:$0 sm:$0xff]  ;;  %v163_v17 = vld [vmem:[%s277_s2] ss:$0 sm:$0xff]  ;;  %v162_v18 = vld [vmem:[%s277_s2 + $0x2] ss:$0 sm:$0xff] }
   0x8   :  { %119 = vmatpush.msra.mxu2 %v150_v7  ;;  %159 = vmatpush.msra.mxu3 %v20_v10 }
   0x9   :  { %155 = vmatmul.msk.f32.vlgmr.msra.gmra.mxu2 %vm27_vm0, %v17_v9  ;;  %84 = vmatpush.msra.mxu1 %v143_v11 }
   0xa   :  { %148 = vmatmul.msk.f32.vlgmr.msra.gmra.mxu1 %vm27_vm0, %v17_v9  ;;  %160 = vmatpush.msra.mxu3 %v19_v12 }
   0xb   :  { %142 = vmatmul.msk.f32.vlgmr.msra.gmra.mxu3 %vm27_vm0, %v18_v13  ;;  %48 = vmatpush.msra.mxu0 %v20_v10 }
   0xd   :  { %49 = vmatpush.msra.mxu0 %v19_v12 }
   0xe   :  { %141 = vmatmul.msk.f32.vlgmr.msra.gmra.mxu0 %vm27_vm0, %v17_v9 }
  0x11   :  { %156 = vmatmul.msk.f32.gmra.mxu2 %vm27_vm0, %v18_v13 }
  0x12   :  { %149 = vmatmul.msk.f32.gmra.mxu1 %vm27_vm0, %v18_v13 }
  0x87   :  { %v86_v15 = vpop.f32.mrf.mxu1 }
  0x88   :  { %v87_v16 = vadd.f32 %v161_v14, %v86_v15 }
  0x8a   :  { %92 = vst.msk [vmem:[%s278_s4] sm:$0xff] %vm27_vm0, %v87_v16 }
  0x8b   :  { %v51_v19 = vpop.f32.mrf.mxu0 }
  0x8c   :  { %v121_v20 = vpop.f32.mrf.mxu2  ;;  %v52_v21 = vadd.f32 %v163_v17, %v51_v19 }
  0x8d   :  { %v122_v22 = vadd.f32 %v162_v18, %v121_v20 }
  0x8e   :  { %57 = vst.msk [vmem:[%s279_s3] sm:$0xff] %vm27_vm0, %v52_v21  ;;  %v54_v23 = vpop.f32.mrf.mxu3 }
  0x8f   :  { %127 = vst.msk [vmem:[%s280_s5] sm:$0xff] %vm27_vm0, %v122_v22  ;;  %v55_v24 = vadd.f32 %v163_v17, %v54_v23  ;;  %v89_v25 = vpop.f32.mrf.mxu1 }
  0x90   :  { %v90_v26 = vadd.f32 %v161_v14, %v89_v25 }
  0x91   :  { %58 = vst.msk [vmem:[%s279_s3 + $0x8] sm:$0xff] %vm27_vm0, %v55_v24 }
  0x92   :  { %93 = vst.msk [vmem:[%s278_s4 + $0x8] sm:$0xff] %vm27_vm0, %v90_v26 }
  0x94   :  { %v124_v27 = vpop.f32.mrf.mxu2 }
  0x95   :  { %v125_v28 = vadd.f32 %v162_v18, %v124_v27 }
  0x97   :  { %128 = vst.msk [vmem:[%s280_s5 + $0x8] sm:$0xff] %vm27_vm0, %v125_v28 }

// kernel: graphormer_encoder_layer.6
= control target key start
LH: loop header
LB: loop body
LE: loop exit
PB: predicated region body
PF: predicated region fallthrough
CT: control target
= control target key end

     0   :  { %vm33_vm0 = vcmask 261120   ;;  %v152_v17 = vmov 32.0   ;;  %s235_s2 = inlined_call_operand.vmem [shape: f32[32,32], index: 2, kind: input, shape index: {}]   ;;  %s236_s3 = inlined_call_operand.vmem [shape: f32[1,32], index: 3, kind: input, shape index: {}]   ;;  %s237_s0 = inlined_call_operand.vmem [shape: f32[16,32], index: 0, kind: input, shape index: {}]   ;;  %s238_s1 = inlined_call_operand.vmem [shape: f32[16,32], index: 1, kind: input, shape index: {}]   ;;  %s239_s4 = inlined_call_operand.vmem [shape: f32[1,32], index: 4, kind: input, shape index: {}]   ;;  %s240_s5 = inlined_call_operand.vmem [shape: f32[1,32], index: 5, kind: input, shape index: {}]   ;;  %s241_s6 = inlined_call_operand.vmem [shape: f32[16,32], index: 6, kind: output, shape index: {}]  }
   0x1   :  { %v28_v0 = vld [vmem:[%s235_s2 + $0x18] sm:$0xff]  ;;  %v27_v1 = vld [vmem:[%s235_s2 + $0x10] sm:$0xff]  ;;  %v26_v2 = vld [vmem:[%s235_s2 + $0x8] sm:$0xff]  ;;  %146 = vrcp.f32 %v152_v17 }
   0x2   :  { %52 = vmatpush.msra.mxu0 %v28_v0  ;;  %138 = vmatpush.msra.mxu1 %v28_v0  ;;  %v25_v3 = vld [vmem:[%s235_s2] sm:$0xff]  ;;  %v24_v5 = vld [vmem:[%s237_s0 + $0x8] sm:$0xff] }
   0x3   :  { %v23_v4 = vld [vmem:[%s237_s0] sm:$0xff]  ;;  %v64_v13 = vld [vmem:[%s238_s1 + $0x8] sm:$0xff] }
   0x4   :  { %53 = vmatpush.msra.mxu0 %v27_v1  ;;  %139 = vmatpush.msra.mxu1 %v27_v1  ;;  %v143_v6 = vld [vmem:[%s236_s3] ss:$0 sm:$0xff] }
   0x5   :  { %v63_v8 = vld [vmem:[%s238_s1] sm:$0xff] }
   0x6   :  { %54 = vmatpush.msra.mxu0 %v26_v2  ;;  %140 = vmatpush.msra.mxu1 %v26_v2  ;;  %v144_v48 = vld [vmem:[%s239_s4] ss:$0 sm:$0xff] }
   0x7   :  { %v147_v18 = vpop.eup %146  ;;  %v145_v51 = vld [vmem:[%s240_s5] ss:$0 sm:$0xff] }
   0x8   :  { %55 = vmatpush.msra.mxu0 %v25_v3  ;;  %141 = vmatpush.msra.mxu1 %v25_v3  ;;  %v76_v19 = vmul.f32 32.0, %v147_v18  ;;  %vm80_vm1 = vweird.f32 %v147_v18 }
   0x9   :  { %136 = vmatmul.msk.f32.vlgmr.msra.gmra.mxu0 %vm33_vm0, %v23_v4  ;;  %137 = vmatmul.msk.f32.vlgmr.msra.gmra.mxu1 %vm33_vm0, %v24_v5 }
   0xa   :  { %v77_v20 = vsub.f32 1.0, %v76_v19 }
   0xc   :  { %v78_v21 = vmul.f32 %v147_v18, %v77_v20 }
   0xe   :  { %v79_v22 = vadd.f32 %v147_v18, %v78_v21 }
  0x10   :  { %v81_v23 = vsel %vm80_vm1, %v147_v18, %v79_v22 }
  0x86   :  { %v57_v7 = vpop.f32.mrf.mxu0  ;;  %v60_v9 = vpop.f32.mrf.mxu1 }
  0x87   :  { %v58_v10 = vadd.f32 %v143_v6, %v57_v7  ;;  %v61_v12 = vadd.f32 %v143_v6, %v60_v9 }
  0x89   :  { %v65_v11 = vadd.f32 %v63_v8, %v58_v10  ;;  %v66_v15 = vadd.f32 %v64_v13, %v61_v12 }
  0x8b   :  { %v69_v14 = vsel %vm33_vm0, %v65_v11, 0.0  ;;  %v72_v16 = vsel %vm33_vm0, %v66_v15, 0.0 }
  0x8c   :  { %70 = vadd.xlane.f32.xlu0 %v69_v14 }
  0x94   :  { %73 = vadd.xlane.f32.xlu0 %v72_v16 }
  0xff   :  { %v71_v24 = vpop.xlane.xlu0 %70 }
 0x100   :  { %v82_v25 = vmul.f32 %v81_v23, %v71_v24 }
 0x102   :  { %v84_v26 = vsub.f32 %v65_v11, %v82_v25 }
 0x104   :  { %v86_v27 = vmul.f32 %v84_v26, %v84_v26 }
 0x106   :  { %v88_v28 = vsel %vm33_vm0, %v86_v27, 0.0 }
 0x107   :  { %89 = vadd.xlane.f32.xlu1 %v88_v28  ;;  %v74_v29 = vpop.xlane.xlu0 %73 }
 0x108   :  { %v83_v30 = vmul.f32 %v81_v23, %v74_v29 }
 0x10a   :  { %v85_v31 = vsub.f32 %v66_v15, %v83_v30 }
 0x10c   :  { %v87_v32 = vmul.f32 %v85_v31, %v85_v31 }
 0x10e   :  { %v91_v33 = vsel %vm33_vm0, %v87_v32, 0.0 }
 0x10f   :  { %92 = vadd.xlane.f32.xlu1 %v91_v33 }
 0x17a   :  { %v90_v34 = vpop.xlane.xlu1 %89 }
 0x17b   :  { %v94_v35 = vmul.f32 %v90_v34, %v81_v23 }
 0x17d   :  { %v96_v36 = vadd.f32 1e-05, %v94_v35 }
 0x17f   :  { %148 = vrsqrt.f32 %v96_v36  ;;  %vm104_vm3 = vweird.f32 %v96_v36 }
 0x182   :  { %v93_v37 = vpop.xlane.xlu1 %92 }
 0x183   :  { %v95_v38 = vmul.f32 %v93_v37, %v81_v23 }
 0x185   :  { %v149_v39 = vpop.eup %148  ;;  %v97_v40 = vadd.f32 1e-05, %v95_v38 }
 0x186   :  { %v99_v41 = vmul.f32 %v149_v39, %v96_v36  ;;  %vm105_vm2 = vweird.f32 %v149_v39 }
 0x187   :  { %150 = vrsqrt.f32 %v97_v40  ;;  %vm106_vm4 = vmor %vm104_vm3, %vm105_vm2  ;;  %vm114_vm6 = vweird.f32 %v97_v40 }
 0x188   :  { %v100_v42 = vmul.f32 %v149_v39, %v99_v41 }
 0x18a   :  { %v101_v43 = vmul.f32 0.5, %v100_v42 }
 0x18c   :  { %v102_v44 = vsub.f32 1.5, %v101_v43 }
 0x18d   :  { %v151_v45 = vpop.eup %150 }
 0x18e   :  { %v103_v46 = vmul.f32 %v149_v39, %v102_v44  ;;  %v109_v47 = vmul.f32 %v151_v45, %v97_v40  ;;  %vm115_vm5 = vweird.f32 %v151_v45 }
 0x18f   :  { %vm116_vm7 = vmor %vm114_vm6, %vm115_vm5 }
 0x190   :  { %v107_v49 = vsel %vm106_vm4, %v149_v39, %v103_v46  ;;  %v110_v50 = vmul.f32 %v151_v45, %v109_v47 }
 0x191   :  { %v118_v52 = vmul.f32 %v107_v49, %v84_v26 }
 0x192   :  { %v111_v53 = vmul.f32 0.5, %v110_v50 }
 0x193   :  { %v123_v54 = vmul.f32 %v144_v48, %v118_v52 }
 0x194   :  { %v112_v55 = vsub.f32 1.5, %v111_v53 }
 0x195   :  { %v128_v56 = vadd.f32 %v145_v51, %v123_v54 }
 0x196   :  { %v113_v57 = vmul.f32 %v151_v45, %v112_v55 }
 0x197   :  { %130 = vst.msk [vmem:[%s241_s6] sm:$0xff] %vm33_vm0, %v128_v56 }
 0x198   :  { %v117_v58 = vsel %vm116_vm7, %v151_v45, %v113_v57 }
 0x199   :  { %v119_v59 = vmul.f32 %v117_v58, %v85_v31 }
 0x19b   :  { %v124_v60 = vmul.f32 %v144_v48, %v119_v59 }
 0x19d   :  { %v129_v61 = vadd.f32 %v145_v51, %v124_v60 }
 0x19f   :  { %131 = vst.msk [vmem:[%s241_s6 + $0x8] sm:$0xff] %vm33_vm0, %v129_v61 }

// kernel: graphormer_encoder_layer.7
= control target key start
LH: loop header
LB: loop body
LE: loop exit
PB: predicated region body
PF: predicated region fallthrough
CT: control target
= control target key end

     0   :  { %vm31_vm0 = vcmask 261120   ;;  %s389_s0 = inlined_call_operand.vmem [shape: f32[16,32], index: 0, kind: input, shape index: {}]   ;;  %s390_s1 = inlined_call_operand.vmem [shape: f32[32,64], index: 1, kind: input, shape index: {}]   ;;  %s391_s2 = inlined_call_operand.vmem [shape: f32[1,64], index: 2, kind: input, shape index: {}]   ;;  %s392_s3 = inlined_call_operand.vmem [shape: f32[64,32], index: 3, kind: input, shape index: {}]   ;;  %s393_s4 = inlined_call_operand.vmem [shape: f32[1,32], index: 4, kind: input, shape index: {}]   ;;  %s394_s5 = inlined_call_operand.vmem [shape: f32[1,32], index: 5, kind: input, shape index: {}]   ;;  %s395_s6 = inlined_call_operand.vmem [shape: f32[1,32], index: 6, kind: input, shape index: {}]   ;;  %s396_s7 = inlined_call_operand.hbm [shape: f32[16,32], index: 7, kind: output, shape index: {}]  }
   0x1   :  { %v39_v0 = vld [vmem:[%s390_s1 + $0x18] sm:$0xff]  ;;  %v38_v1 = vld [vmem:[%s390_s1 + $0x10] sm:$0xff]  ;;  %v37_v2 = vld [vmem:[%s390_s1 + $0x8] sm:$0xff] }
   0x2   :  { %63 = vmatpush.msra.mxu0 %v39_v0  ;;  %222 = vmatpush.msra.mxu3 %v39_v0  ;;  %v85_v3 = vld [vmem:[%s392_s3 + $0x38] sm:$0xff]  ;;  %v36_v4 = vld [vmem:[%s390_s1] sm:$0xff]  ;;  %v84_v5 = vld [vmem:[%s392_s3 + $0x30] sm:$0xff] }
   0x3   :  { %v34_v6 = vld [vmem:[%s389_s0] sm:$0xff]  ;;  %101 = vmatpush.msra.mxu1 %v85_v3  ;;  %226 = vmatpush.msra.mxu2 %v85_v3  ;;  %v35_v7 = vld [vmem:[%s389_s0 + $0x8] sm:$0xff] }
   0x4   :  { %64 = vmatpush.msra.mxu0 %v38_v1  ;;  %223 = vmatpush.msra.mxu3 %v38_v1 }
   0x6   :  { %65 = vmatpush.msra.mxu0 %v37_v2  ;;  %224 = vmatpush.msra.mxu3 %v37_v2 }
   0x7   :  { %12 = vsyncpa [#allocation4], 0  ;;  %102 = vmatpush.msra.mxu1 %v84_v5  ;;  %v83_v8 = vld [vmem:[%s392_s3 + $0x28] sm:$0xff]  ;;  %227 = vmatpush.msra.mxu2 %v84_v5  ;;  %v82_v9 = vld [vmem:[%s392_s3 + $0x20] sm:$0xff]  ;;  %v275_v14 = vmov 0.0   ;;  %vm86_vm1 = vcmask 523264  }
   0x8   :  { %66 = vmatpush.msra.mxu0 %v36_v4  ;;  %225 = vmatpush.msra.mxu3 %v36_v4  ;;  %v81_v10 = vld [vmem:[%s392_s3 + $0x18] sm:$0xff]  ;;  %v80_v11 = vld [vmem:[%s392_s3 + $0x10] sm:$0xff]  ;;  %v79_v12 = vld [vmem:[%s392_s3 + $0x8] sm:$0xff]  ;;  %32 = vst.msk [vmem:[#allocation2] sm:$0xff] %vm31_vm0, %v275_v14  ;;  %v276_v37 = vmov 32.0   ;;  %s278_s12 = smov 128  }
   0x9   :  { %218 = vmatmul.msk.f32.vlgmr.msra.gmra.mxu0 %vm31_vm0, %v34_v6  ;;  %219 = vmatmul.msk.f32.vlgmr.msra.gmra.mxu3 %vm31_vm0, %v35_v7  ;;  %v78_v13 = vld [vmem:[%s392_s3] sm:$0xff]  ;;  %33 = vst.msk [vmem:[#allocation2 + $0x8] sm:$0xff] %vm31_vm0, %v275_v14  ;;  %243 = vrcp.f32 %v276_v37  ;;  %s279_s13 = smov 8  }
   0xa   :  { %103 = vmatpush.msra.mxu1 %v83_v8  ;;  %228 = vmatpush.msra.mxu2 %v83_v8  ;;  %v239_v15 = vld [vmem:[%s391_s2] ss:$0 sm:$0xff] }
   0xb   :  { %v240_v25 = vld [vmem:[%s393_s4] ss:$0 sm:$0xff] }
   0xc   :  { %104 = vmatpush.msra.mxu1 %v82_v9  ;;  %229 = vmatpush.msra.mxu2 %v82_v9  ;;  %v241_v2 = vld [vmem:[%s394_s5] ss:$0 sm:$0xff]  ;;  %s277_s5 = smov [#allocation3]  }
   0xd   :  { %s204_s9 = sshll.u32 %s277_s5, 4  ;;  %s205_s9 = int_to_ptr.vmem [resolvable:$true] %s204_s9 }
   0xe   :  { %105 = vmatpush.msra.mxu1 %v81_v10  ;;  %230 = vmatpush.msra.mxu2 %v81_v10 }
   0xf   :  { %v76_v22 = vld [vmem:[#allocation2] sm:$0xff]  ;;  %v244_v38 = vpop.eup %243 }
  0x10   :  { %106 = vmatpush.msra.mxu1 %v80_v11  ;;  %231 = vmatpush.msra.mxu2 %v80_v11  ;;  %v77_v26 = vld [vmem:[#allocation2 + $0x8] sm:$0xff]  ;;  %v144_v39 = vmul.f32 32.0, %v244_v38  ;;  %vm148_vm2 = vweird.f32 %v244_v38 }
  0x12   :  { %107 = vmatpush.msra.mxu1 %v79_v12  ;;  %232 = vmatpush.msra.mxu2 %v79_v12  ;;  %v145_v40 = vsub.f32 1.0, %v144_v39 }
  0x14   :  { %108 = vmatpush.msra.mxu1 %v78_v13  ;;  %233 = vmatpush.msra.mxu2 %v78_v13  ;;  %v146_v41 = vmul.f32 %v244_v38, %v145_v40 }
  0x16   :  { %v147_v42 = vadd.f32 %v244_v38, %v146_v41 }
  0x18   :  { %v149_v43 = vsel %vm148_vm2, %v244_v38, %v147_v42 }
  0x86   :  { %v68_v16 = vpop.f32.mrf.mxu0 }
  0x87   :  { %v69_v17 = vadd.f32 %v239_v15, %v68_v16 }
  0x89   :  { %v74_v18 = vmax.f32 %v69_v17, 0.0 }
  0x8b   :  { %220 = vmatmul.msk.f32.vlgmr.msra.gmra.mxu1 %vm86_vm1, %v74_v18 }
  0x8c   :  { %v71_v19 = vpop.f32.mrf.mxu3 }
  0x8d   :  { %v72_v20 = vadd.f32 %v239_v15, %v71_v19 }
  0x8f   :  { %v75_v21 = vmax.f32 %v72_v20, 0.0 }
  0x91   :  { %221 = vmatmul.msk.f32.vlgmr.msra.gmra.mxu2 %vm86_vm1, %v75_v21 }
 0x108   :  { %v110_v23 = vpop.f32.mrf.mxu1 }
 0x109   :  { %v116_v24 = vadd.f32 %v110_v23, %v76_v22 }
 0x10b   :  { %118 = vst.msk [vmem:[#allocation2] sm:$0xff] %vm31_vm0, %v116_v24 }
 0x112   :  { %v123_v27 = vld [vmem:[#allocation2] sm:$0xff] }
 0x113   :  { %v129_v28 = vadd.f32 %v240_v25, %v123_v27 }
 0x114   :  { %v113_v29 = vpop.f32.mrf.mxu2 }
 0x115   :  { %v117_v30 = vadd.f32 %v113_v29, %v77_v26  ;;  %v133_v31 = vadd.f32 %v129_v28, %v34_v6  ;;  %v242_v6 = vld [vmem:[%s395_s6] ss:$0 sm:$0xff]  ;;  %s206_s6 = sshll.u32 %s396_s7, 4  ;;  %s207_s6 = int_to_ptr.hbm [resolvable:$true] %s206_s6 }
 0x117   :  { %119 = vst.msk [vmem:[#allocation2 + $0x8] sm:$0xff] %vm31_vm0, %v117_v30  ;;  %v137_v32 = vsel %vm31_vm0, %v133_v31, 0.0 }
 0x118   :  { %138 = vadd.xlane.f32.xlu0 %v137_v32 }
 0x11e   :  { %v124_v33 = vld [vmem:[#allocation2 + $0x8] sm:$0xff] }
 0x11f   :  { %v130_v34 = vadd.f32 %v240_v25, %v124_v33 }
 0x121   :  { %v134_v35 = vadd.f32 %v130_v34, %v35_v7 }
 0x123   :  { %v140_v36 = vsel %vm31_vm0, %v134_v35, 0.0 }
 0x124   :  { %141 = vadd.xlane.f32.xlu0 %v140_v36 }
 0x18b   :  { %v139_v44 = vpop.xlane.xlu0 %138 }
 0x18c   :  { %v150_v45 = vmul.f32 %v149_v43, %v139_v44 }
 0x18e   :  { %v152_v46 = vsub.f32 %v133_v31, %v150_v45 }
 0x190   :  { %v154_v47 = vmul.f32 %v152_v46, %v152_v46 }
 0x192   :  { %v156_v48 = vsel %vm31_vm0, %v154_v47, 0.0 }
 0x193   :  { %157 = vadd.xlane.f32.xlu1 %v156_v48 }
 0x197   :  { %v142_v49 = vpop.xlane.xlu0 %141 }
 0x198   :  { %v151_v50 = vmul.f32 %v149_v43, %v142_v49 }
 0x19a   :  { %v153_v51 = vsub.f32 %v134_v35, %v151_v50 }
 0x19c   :  { %v155_v52 = vmul.f32 %v153_v51, %v153_v51 }
 0x19e   :  { %v159_v53 = vsel %vm31_vm0, %v155_v52, 0.0 }
 0x19f   :  { %160 = vadd.xlane.f32.xlu1 %v159_v53 }
 0x206   :  { %v158_v54 = vpop.xlane.xlu1 %157 }
 0x207   :  { %v162_v55 = vmul.f32 %v158_v54, %v149_v43 }
 0x209   :  { %v164_v56 = vadd.f32 1e-05, %v162_v55 }
 0x20b   :  { %245 = vrsqrt.f32 %v164_v56  ;;  %vm172_vm4 = vweird.f32 %v164_v56 }
 0x211   :  { %v246_v57 = vpop.eup %245 }
 0x212   :  { %v167_v58 = vmul.f32 %v246_v57, %v164_v56  ;;  %v161_v59 = vpop.xlane.xlu1 %160  ;;  %vm173_vm3 = vweird.f32 %v246_v57 }
 0x213   :  { %v163_v60 = vmul.f32 %v161_v59, %v149_v43  ;;  %vm174_vm5 = vmor %vm172_vm4, %vm173_vm3 }
 0x214   :  { %v168_v61 = vmul.f32 %v246_v57, %v167_v58 }
 0x215   :  { %v165_v62 = vadd.f32 1e-05, %v163_v60 }
 0x216   :  { %v169_v63 = vmul.f32 0.5, %v168_v61 }
 0x217   :  { %247 = vrsqrt.f32 %v165_v62  ;;  %vm182_vm7 = vweird.f32 %v165_v62 }
 0x218   :  { %v170_v0 = vsub.f32 1.5, %v169_v63 }
 0x21a   :  { %v171_v1 = vmul.f32 %v246_v57, %v170_v0 }
 0x21c   :  { %v175_v3 = vsel %vm174_vm5, %v246_v57, %v171_v1 }
 0x21d   :  { %v248_v4 = vpop.eup %247  ;;  %v186_v5 = vmul.f32 %v175_v3, %v152_v46 }
 0x21e   :  { %v177_v7 = vmul.f32 %v248_v4, %v165_v62  ;;  %vm183_vm6 = vweird.f32 %v248_v4 }
 0x21f   :  { %v191_v8 = vmul.f32 %v241_v2, %v186_v5  ;;  %vm184_vm8 = vmor %vm182_vm7, %vm183_vm6 }
 0x220   :  { %v178_v9 = vmul.f32 %v248_v4, %v177_v7 }
 0x221   :  { %v196_v10 = vadd.f32 %v242_v6, %v191_v8 }
 0x222   :  { %v179_v11 = vmul.f32 0.5, %v178_v9 }
 0x223   :  { %198 = vst.msk [vmem:[#allocation3] sm:$0xff] %vm31_vm0, %v196_v10 }
 0x224   :  { %v180_v12 = vsub.f32 1.5, %v179_v11 }
 0x226   :  { %v181_v13 = vmul.f32 %v248_v4, %v180_v12 }
 0x228   :  { %v185_v14 = vsel %vm184_vm8, %v248_v4, %v181_v13 }
 0x229   :  { %v187_v15 = vmul.f32 %v185_v14, %v153_v51 }
 0x22b   :  { %v192_v16 = vmul.f32 %v241_v2, %v187_v15 }
 0x22d   :  { %v197_v17 = vadd.f32 %v242_v6, %v192_v16 }
 0x22f   :  { %199 = vst.msk [vmem:[#allocation3 + $0x8] sm:$0xff] %vm31_vm0, %v197_v17 }
 0x230   :  { %212 = dma.vmem_to_hbm [thread:$0]  %s205_s9, 256, %s207_s6, [#allocation4], %s278_s12, %s278_s12, %s279_s13  }
 0x231   :  { %273 = dma.done.wait [#allocation4], 256  }
 0x232   :  { %274 = vsyncadd [#allocation4], 4294967040 }
 0x233   :  { %217 = vsyncpa [#allocation4], 1 }

// kernel: graphormer_encoder_layer.5
= control target key start
LH: loop header
LB: loop body
LE: loop exit
PB: predicated region body
PF: predicated region fallthrough
CT: control target
= control target key end

     0   :  { %vm50_vm0 = vcmask 1041409   ;;  %vm53_vm1 = vcmask 1042434   ;;  %vm56_vm2 = vcmask 1043459   ;;  %vm59_vm3 = vcmask 1044484   ;;  %s2668_s1 = inlined_call_operand.vmem [shape: f32[8,8,8], index: 1, kind: input, shape index: {}]   ;;  %s2669_s0 = inlined_call_operand.vmem [shape: f32[8,8,8], index: 0, kind: input, shape index: {}]   ;;  %s2670_s3 = inlined_call_operand.vmem [shape: f32[8,8,8], index: 3, kind: input, shape index: {}]   ;;  %s2671_s2 = inlined_call_operand.vmem [shape: f32[8,8,8], index: 2, kind: input, shape index: {}]   ;;  %s2672_s4 = inlined_call_operand.vmem [shape: f32[8,8,8], index: 4, kind: output, shape index: {}]  }
   0x1   :  { %v26_v0 = vld [vmem:[%s2668_s1 + $0x8] sm:$0x1]  ;;  %v27_v1 = vld [vmem:[%s2668_s1 + $0x10] sm:$0x1]  ;;  %v28_v2 = vld [vmem:[%s2668_s1 + $0x18] sm:$0x1] }
   0x2   :  { %v29_v3 = vld [vmem:[%s2668_s1 + $0x20] sm:$0x1]  ;;  %v30_v4 = vld [vmem:[%s2668_s1 + $0x28] sm:$0x1]  ;;  %v31_v6 = vld [vmem:[%s2668_s1 + $0x30] sm:$0x1] }
   0x3   :  { %v25_v5 = vld [vmem:[%s2668_s1] sm:$0x1]  ;;  %v32_v7 = vld [vmem:[%s2668_s1 + $0x38] sm:$0x1]  ;;  %vm62_vm4 = vcmask 1045509   ;;  %v78_v8 = vrot.slane %v26_v0, 7 }
   0x4   :  { %v80_v9 = vrot.slane %v27_v1, 6  ;;  %v82_v10 = vrot.slane %v28_v2, 5  ;;  %v17_v11 = vld [vmem:[%s2669_s0] sm:$0x1]  ;;  %vm65_vm5 = vcmask 1046534   ;;  %v84_v12 = vrot.slane %v29_v3, 4 }
   0x5   :  { %v86_v13 = vrot.slane %v30_v4, 3  ;;  %v88_v14 = vrot.slane %v31_v6, 2  ;;  %v18_v15 = vld [vmem:[%s2669_s0 + $0x8] sm:$0x1]  ;;  %v79_v16 = vsel %vm50_vm0, %v78_v8, %v25_v5  ;;  %v90_v17 = vrot.slane %v32_v7, 1 }
   0x6   :  { %v19_v18 = vld [vmem:[%s2669_s0 + $0x10] sm:$0x1]  ;;  %v20_v19 = vld [vmem:[%s2669_s0 + $0x18] sm:$0x1]  ;;  %v49_v20 = vrot.slane %v18_v15, 7  ;;  %v81_v21 = vsel %vm53_vm1, %v80_v9, %v79_v16  ;;  %vm68_vm6 = vcmask 1047559  }
   0x7   :  { %v21_v22 = vld [vmem:[%s2669_s0 + $0x20] sm:$0x1]  ;;  %v22_v23 = vld [vmem:[%s2669_s0 + $0x28] sm:$0x1]  ;;  %v23_v24 = vld [vmem:[%s2669_s0 + $0x30] sm:$0x1]  ;;  %v83_v25 = vsel %vm56_vm2, %v82_v10, %v81_v21 }
   0x8   :  { %v24_v26 = vld [vmem:[%s2669_s0 + $0x38] sm:$0x1]  ;;  %v51_v27 = vsel %vm50_vm0, %v49_v20, %v17_v11  ;;  %v52_v28 = vrot.slane %v19_v18, 6  ;;  %v55_v29 = vrot.slane %v20_v19, 5  ;;  %v85_v30 = vsel %vm59_vm3, %v84_v12, %v83_v25  ;;  %v210_v44 = vld [vmem:[%s2668_s1 + $0x9] sm:$0x1] }
   0x9   :  { %v58_v31 = vrot.slane %v21_v22, 4  ;;  %v61_v32 = vrot.slane %v22_v23, 3  ;;  %v87_v33 = vsel %vm62_vm4, %v86_v13, %v85_v30  ;;  %vm92_vm7 = vcmask 64512   ;;  %v211_v45 = vld [vmem:[%s2668_s1 + $0x11] sm:$0x1]  ;;  %v118_v25 = vld [vmem:[%s2670_s3] sm:$0xff] }
   0xa   :  { %v54_v34 = vsel %vm53_vm1, %v52_v28, %v51_v27  ;;  %v64_v35 = vrot.slane %v23_v24, 2  ;;  %v89_v36 = vsel %vm65_vm5, %v88_v14, %v87_v33  ;;  %v67_v38 = vrot.slane %v24_v26, 1  ;;  %v209_v47 = vld [vmem:[%s2668_s1 + $0x1] sm:$0x1]  ;;  %v212_v48 = vld [vmem:[%s2668_s1 + $0x19] sm:$0x1] }
   0xb   :  { %v57_v37 = vsel %vm56_vm2, %v55_v29, %v54_v34  ;;  %v91_v39 = vsel %vm68_vm6, %v90_v17, %v89_v36  ;;  %v255_v46 = vrot.slane %v210_v44, 7  ;;  %v257_v49 = vrot.slane %v211_v45, 6  ;;  %v213_v50 = vld [vmem:[%s2668_s1 + $0x21] sm:$0x1]  ;;  %v202_v53 = vld [vmem:[%s2669_s0 + $0x9] sm:$0x1] }
   0xc   :  { %v60_v40 = vsel %vm59_vm3, %v58_v31, %v57_v37  ;;  %1437 = vmatpush.xpose.msk.msra.mxu0 %vm92_vm7, %v91_v39  ;;  %v259_v52 = vrot.slane %v212_v48, 5  ;;  %v214_v54 = vld [vmem:[%s2668_s1 + $0x29] sm:$0x1]  ;;  %v261_v56 = vrot.slane %v213_v50, 4  ;;  %v203_v57 = vld [vmem:[%s2669_s0 + $0x11] sm:$0x1] }
   0xd   :  { %v63_v41 = vsel %vm62_vm4, %v61_v32, %v60_v40  ;;  %v256_v51 = vsel %vm50_vm0, %v255_v46, %v209_v47  ;;  %v233_v58 = vrot.slane %v202_v53, 7  ;;  %v215_v59 = vld [vmem:[%s2668_s1 + $0x31] sm:$0x1]  ;;  %v263_v61 = vrot.slane %v214_v54, 3  ;;  %v201_v62 = vld [vmem:[%s2669_s0 + $0x1] sm:$0x1] }
   0xe   :  { %v66_v42 = vsel %vm65_vm5, %v64_v35, %v63_v41  ;;  %v258_v55 = vsel %vm53_vm1, %v257_v49, %v256_v51  ;;  %v235_v63 = vrot.slane %v203_v57, 6  ;;  %v216_v0 = vld [vmem:[%s2668_s1 + $0x39] sm:$0x1]  ;;  %v265_v2 = vrot.slane %v215_v59, 2  ;;  %v205_v7 = vld [vmem:[%s2669_s0 + $0x21] sm:$0x1] }
   0xf   :  { %v69_v43 = vsel %vm68_vm6, %v67_v38, %v66_v42  ;;  %v260_v60 = vsel %vm56_vm2, %v259_v52, %v258_v55  ;;  %v204_v3 = vld [vmem:[%s2669_s0 + $0x19] sm:$0x1]  ;;  %v234_v4 = vsel %vm50_vm0, %v233_v58, %v201_v62  ;;  %v267_v6 = vrot.slane %v216_v0, 1  ;;  %v206_v8 = vld [vmem:[%s2669_s0 + $0x29] sm:$0x1] }
  0x10   :  { %1438 = vmatmul.msk.f32.vlgmr.msra.gmra.mxu0 %vm92_vm7, %v69_v43  ;;  %v262_v1 = vsel %vm59_vm3, %v261_v56, %v260_v60  ;;  %v236_v9 = vsel %vm53_vm1, %v235_v63, %v234_v4  ;;  %v237_v10 = vrot.slane %v204_v3, 5  ;;  %v207_v12 = vld [vmem:[%s2669_s0 + $0x31] sm:$0x1]  ;;  %v208_v13 = vld [vmem:[%s2669_s0 + $0x39] sm:$0x1]  ;;  %v239_v14 = vrot.slane %v205_v7, 4 }
  0x11   :  { %v264_v5 = vsel %vm62_vm4, %v263_v61, %v262_v1  ;;  %v241_v15 = vrot.slane %v206_v8, 3  ;;  %v243_v18 = vrot.slane %v207_v12, 2  ;;  %v245_v19 = vrot.slane %v208_v13, 1  ;;  %v562_v29 = vld [vmem:[%s2668_s1 + $0xb] sm:$0x1] }
  0x12   :  { %v266_v11 = vsel %vm65_vm5, %v265_v2, %v264_v5  ;;  %v238_v17 = vsel %vm56_vm2, %v237_v10, %v236_v9  ;;  %v563_v30 = vld [vmem:[%s2668_s1 + $0x13] sm:$0x1]  ;;  %v607_v31 = vrot.slane %v562_v29, 7  ;;  %v561_v32 = vld [vmem:[%s2668_s1 + $0x3] sm:$0x1]  ;;  %vm192_vm8 = vcmask 57344  }
  0x13   :  { %v268_v16 = vsel %vm68_vm6, %v267_v6, %v266_v11  ;;  %v240_v20 = vsel %vm59_vm3, %v239_v14, %v238_v17  ;;  %v564_v33 = vld [vmem:[%s2668_s1 + $0x1b] sm:$0x1]  ;;  %v609_v34 = vrot.slane %v563_v30, 6  ;;  %v565_v35 = vld [vmem:[%s2668_s1 + $0x23] sm:$0x1] }
  0x14   :  { %1440 = vmatpush.xpose.msk.msra.mxu2 %vm92_vm7, %v268_v16  ;;  %v242_v21 = vsel %vm62_vm4, %v241_v15, %v240_v20  ;;  %v608_v36 = vsel %vm50_vm0, %v607_v31, %v561_v32  ;;  %v611_v37 = vrot.slane %v564_v33, 5  ;;  %v554_v38 = vld [vmem:[%s2669_s0 + $0xb] sm:$0x1]  ;;  %v613_v41 = vrot.slane %v565_v35, 4  ;;  %v555_v42 = vld [vmem:[%s2669_s0 + $0x13] sm:$0x1] }
  0x15   :  { %v244_v22 = vsel %vm65_vm5, %v243_v18, %v242_v21  ;;  %v566_v39 = vld [vmem:[%s2668_s1 + $0x2b] sm:$0x1]  ;;  %v610_v40 = vsel %vm53_vm1, %v609_v34, %v608_v36  ;;  %v585_v43 = vrot.slane %v554_v38, 7  ;;  %v567_v44 = vld [vmem:[%s2668_s1 + $0x33] sm:$0x1]  ;;  %v587_v48 = vrot.slane %v555_v42, 6 }
  0x16   :  { %v246_v23 = vsel %vm68_vm6, %v245_v19, %v244_v22  ;;  %v612_v45 = vsel %vm56_vm2, %v611_v37, %v610_v40  ;;  %v615_v46 = vrot.slane %v566_v39, 3  ;;  %v553_v47 = vld [vmem:[%s2669_s0 + $0x3] sm:$0x1]  ;;  %v568_v49 = vld [vmem:[%s2668_s1 + $0x3b] sm:$0x1]  ;;  %v617_v51 = vrot.slane %v567_v44, 2 }
  0x17   :  { %1441 = vmatmul.msk.f32.vlgmr.msra.gmra.mxu2 %vm92_vm7, %v246_v23  ;;  %v614_v50 = vsel %vm59_vm3, %v613_v41, %v612_v45  ;;  %v556_v52 = vld [vmem:[%s2669_s0 + $0x1b] sm:$0x1]  ;;  %v586_v53 = vsel %vm50_vm0, %v585_v43, %v553_v47  ;;  %v619_v55 = vrot.slane %v568_v49, 1  ;;  %v557_v56 = vld [vmem:[%s2669_s0 + $0x23] sm:$0x1] }
  0x18   :  { %v616_v54 = vsel %vm62_vm4, %v615_v46, %v614_v50  ;;  %v558_v57 = vld [vmem:[%s2669_s0 + $0x2b] sm:$0x1]  ;;  %v588_v58 = vsel %vm53_vm1, %v587_v48, %v586_v53  ;;  %v589_v59 = vrot.slane %v556_v52, 5  ;;  %v559_v61 = vld [vmem:[%s2669_s0 + $0x33] sm:$0x1]  ;;  %v591_v62 = vrot.slane %v557_v56, 4 }
  0x19   :  { %v618_v60 = vsel %vm65_vm5, %v617_v51, %v616_v54  ;;  %v593_v63 = vrot.slane %v558_v57, 3  ;;  %v914_v0 = vld [vmem:[%s2668_s1 + $0xd] sm:$0x1]  ;;  %v560_v2 = vld [vmem:[%s2669_s0 + $0x3b] sm:$0x1]  ;;  %v595_v4 = vrot.slane %v559_v61, 2 }
  0x1a   :  { %v620_v1 = vsel %vm68_vm6, %v619_v55, %v618_v60  ;;  %v590_v3 = vsel %vm56_vm2, %v589_v59, %v588_v58  ;;  %v915_v5 = vld [vmem:[%s2668_s1 + $0x15] sm:$0x1]  ;;  %v959_v6 = vrot.slane %v914_v0, 7  ;;  %v597_v8 = vrot.slane %v560_v2, 1  ;;  %v913_v9 = vld [vmem:[%s2668_s1 + $0x5] sm:$0x1] }
  0x1b   :  { %1448 = vmatpush.xpose.msk.msrb.mxu0 %vm92_vm7, %v620_v1  ;;  %v592_v7 = vsel %vm59_vm3, %v591_v62, %v590_v3  ;;  %v916_v10 = vld [vmem:[%s2668_s1 + $0x1d] sm:$0x1]  ;;  %v961_v11 = vrot.slane %v915_v5, 6  ;;  %v917_v13 = vld [vmem:[%s2668_s1 + $0x25] sm:$0x1]  ;;  %v1442_v55 = vld [vmem:[%s2670_s3 + $0x8] sm:$0xff] }
  0x1c   :  { %v594_v12 = vsel %vm62_vm4, %v593_v63, %v592_v7  ;;  %v960_v14 = vsel %vm50_vm0, %v959_v6, %v913_v9  ;;  %v963_v15 = vrot.slane %v916_v10, 5  ;;  %v906_v16 = vld [vmem:[%s2669_s0 + $0xd] sm:$0x1]  ;;  %v965_v20 = vrot.slane %v917_v13, 4  ;;  %v907_v21 = vld [vmem:[%s2669_s0 + $0x15] sm:$0x1] }
  0x1d   :  { %v596_v17 = vsel %vm65_vm5, %v595_v4, %v594_v12  ;;  %v918_v18 = vld [vmem:[%s2668_s1 + $0x2d] sm:$0x1]  ;;  %v962_v19 = vsel %vm53_vm1, %v961_v11, %v960_v14  ;;  %v937_v22 = vrot.slane %v906_v16, 7  ;;  %v939_v29 = vrot.slane %v907_v21, 6  ;;  %v920_v30 = vld [vmem:[%s2668_s1 + $0x3d] sm:$0x1] }
  0x1e   :  { %v598_v23 = vsel %vm68_vm6, %v597_v8, %v596_v17  ;;  %v908_v33 = vld [vmem:[%s2669_s0 + $0x1d] sm:$0x1]  ;;  %v971_v36 = vrot.slane %v920_v30, 1  ;;  %v909_v37 = vld [vmem:[%s2669_s0 + $0x25] sm:$0x1] }
  0x1f   :  { %1449 = vmatmul.msk.f32.vlgmr.msrb.gmra.mxu0 %vm92_vm7, %v598_v23  ;;  %v910_v38 = vld [vmem:[%s2669_s0 + $0x2d] sm:$0x1]  ;;  %v941_v40 = vrot.slane %v908_v33, 5  ;;  %v911_v42 = vld [vmem:[%s2669_s0 + $0x35] sm:$0x1]  ;;  %v943_v43 = vrot.slane %v909_v37, 4 }
  0x20   :  { %v945_v44 = vrot.slane %v910_v38, 3  ;;  %v912_v46 = vld [vmem:[%s2669_s0 + $0x3d] sm:$0x1]  ;;  %v947_v48 = vrot.slane %v911_v42, 2  ;;  %v34_v0 = vld [vmem:[%s2671_s2 + $0x8] sm:$0x1] }
  0x21   :  { %v949_v50 = vrot.slane %v912_v46, 1  ;;  %v35_v1 = vld [vmem:[%s2671_s2 + $0x10] sm:$0x1]  ;;  %v139_v2 = vrot.slane %v34_v0, 7  ;;  %v36_v3 = vld [vmem:[%s2671_s2 + $0x18] sm:$0x1] }
  0x22   :  { %v37_v4 = vld [vmem:[%s2671_s2 + $0x20] sm:$0x1]  ;;  %v38_v5 = vld [vmem:[%s2671_s2 + $0x28] sm:$0x1]  ;;  %v39_v6 = vld [vmem:[%s2671_s2 + $0x30] sm:$0x1] }
  0x23   :  { %v40_v8 = vld [vmem:[%s2671_s2 + $0x38] sm:$0x1]  ;;  %v141_v9 = vrot.slane %v35_v1, 6  ;;  %v143_v10 = vrot.slane %v36_v3, 5  ;;  %v145_v11 = vrot.slane %v37_v4, 4  ;;  %v147_v12 = vrot.slane %v38_v5, 3 }
  0x24   :  { %v149_v14 = vrot.slane %v39_v6, 2  ;;  %v151_v17 = vrot.slane %v40_v8, 1  ;;  %v388_v23 = vld [vmem:[%s2668_s1 + $0x1a] sm:$0x1]  ;;  %v738_v46 = vld [vmem:[%s2668_s1 + $0xc] sm:$0x1] }
  0x25   :  { %v741_v3 = vld [vmem:[%s2668_s1 + $0x24] sm:$0x1]  ;;  %v1906_v6 = vld [vmem:[%s2669_s0 + $0x2a] sm:$0x1] }
  0x8d   :  { %v114_v24 = vpop.f32.mrf.mxu0 }
  0x8e   :  { %v117_v26 = vmul.f32 0.35355338, %v114_v24  ;;  %v919_v24 = vld [vmem:[%s2668_s1 + $0x35] sm:$0x1] }
  0x8f   :  { %v969_v32 = vrot.slane %v919_v24, 2 }
  0x90   :  { %v1656_v27 = vadd.f32 %v118_v25, %v117_v26  ;;  %v964_v25 = vsel %vm56_vm2, %v963_v15, %v962_v19  ;;  %v967_v26 = vrot.slane %v918_v18, 3  ;;  %v386_v15 = vld [vmem:[%s2668_s1 + $0xa] sm:$0x1]  ;;  %v387_v18 = vld [vmem:[%s2668_s1 + $0x12] sm:$0x1] }
  0x91   :  { %v966_v31 = vsel %vm59_vm3, %v965_v20, %v964_v25  ;;  %v431_v19 = vrot.slane %v386_v15, 7  ;;  %v433_v24 = vrot.slane %v387_v18, 6 }
  0x92   :  { %v120_v28 = vsel %vm92_vm7, %v1656_v27, -inf  ;;  %v968_v35 = vsel %vm62_vm4, %v967_v26, %v966_v31  ;;  %v389_v26 = vld [vmem:[%s2668_s1 + $0x22] sm:$0x1]  ;;  %v390_v31 = vld [vmem:[%s2668_s1 + $0x2a] sm:$0x1] }
  0x93   :  { %121 = vmax.xlane.f32.xlu0 %v120_v28  ;;  %v905_v28 = vld [vmem:[%s2669_s0 + $0x5] sm:$0x1]  ;;  %v970_v41 = vsel %vm65_vm5, %v969_v32, %v968_v35  ;;  %v437_v33 = vrot.slane %v389_v26, 4  ;;  %v391_v35 = vld [vmem:[%s2668_s1 + $0x32] sm:$0x1]  ;;  %v439_v38 = vrot.slane %v390_v31, 3 }
  0x94   :  { %v938_v34 = vsel %vm50_vm0, %v937_v22, %v905_v28  ;;  %v972_v45 = vsel %vm68_vm6, %v971_v36, %v970_v41  ;;  %v385_v22 = vld [vmem:[%s2668_s1 + $0x2] sm:$0x1]  ;;  %v392_v36 = vld [vmem:[%s2668_s1 + $0x3a] sm:$0x1]  ;;  %v1089_v26 = vld [vmem:[%s2668_s1 + $0x6] sm:$0x1] }
  0x95   :  { %v940_v39 = vsel %vm53_vm1, %v939_v29, %v938_v34  ;;  %1456 = vmatpush.xpose.msk.msra.mxu0 %vm92_vm7, %v972_v45  ;;  %v432_v28 = vsel %vm50_vm0, %v431_v19, %v385_v22  ;;  %v435_v29 = vrot.slane %v388_v23, 5  ;;  %v443_v41 = vrot.slane %v392_v36, 1 }
  0x96   :  { %v942_v47 = vsel %vm56_vm2, %v941_v40, %v940_v39  ;;  %v434_v32 = vsel %vm53_vm1, %v433_v24, %v432_v28  ;;  %v441_v40 = vrot.slane %v391_v35, 2  ;;  %v1092_v28 = vld [vmem:[%s2668_s1 + $0x1e] sm:$0x1] }
  0x97   :  { %v944_v49 = vsel %vm59_vm3, %v943_v43, %v942_v47  ;;  %v436_v37 = vsel %vm56_vm2, %v435_v29, %v434_v32  ;;  %v378_v43 = vld [vmem:[%s2669_s0 + $0xa] sm:$0x1]  ;;  %v1265_v29 = vld [vmem:[%s2668_s1 + $0x7] sm:$0x1] }
  0x98   :  { %v946_v51 = vsel %vm62_vm4, %v945_v44, %v944_v49  ;;  %v438_v39 = vsel %vm59_vm3, %v437_v33, %v436_v37  ;;  %v739_v49 = vld [vmem:[%s2668_s1 + $0x14] sm:$0x1]  ;;  %v1267_v33 = vld [vmem:[%s2668_s1 + $0x17] sm:$0x1] }
  0x99   :  { %v948_v52 = vsel %vm65_vm5, %v947_v48, %v946_v51  ;;  %v440_v42 = vsel %vm62_vm4, %v439_v38, %v438_v39  ;;  %v409_v48 = vrot.slane %v378_v43, 7  ;;  %v744_v38 = vld [vmem:[%s2668_s1 + $0x3c] sm:$0x1]  ;;  %v1962_v39 = vld [vmem:[%s2669_s0 + $0x14] sm:$0x1] }
  0x9a   :  { %v950_v53 = vsel %vm68_vm6, %v949_v50, %v948_v52  ;;  %v290_v54 = vpop.f32.mrf.mxu2  ;;  %v442_v44 = vsel %vm65_vm5, %v441_v40, %v440_v42  ;;  %v783_v50 = vrot.slane %v738_v46, 7  ;;  %v1270_v42 = vld [vmem:[%s2668_s1 + $0x2f] sm:$0x1]  ;;  %v1271_v43 = vld [vmem:[%s2668_s1 + $0x37] sm:$0x1] }
  0x9b   :  { %1457 = vmatmul.msk.f32.vlgmr.msra.gmra.mxu0 %vm92_vm7, %v950_v53  ;;  %v293_v56 = vmul.f32 0.35355338, %v290_v54  ;;  %v444_v45 = vsel %vm68_vm6, %v443_v41, %v442_v44  ;;  %v379_v53 = vld [vmem:[%s2669_s0 + $0x12] sm:$0x1]  ;;  %v737_v54 = vld [vmem:[%s2668_s1 + $0x4] sm:$0x1] }
  0x9c   :  { %v642_v20 = vpop.f32.mrf.mxu0  ;;  %v411_v0 = vrot.slane %v379_v53, 6  ;;  %v784_v1 = vsel %vm50_vm0, %v783_v50, %v737_v54  ;;  %v1269_v41 = vld [vmem:[%s2668_s1 + $0x27] sm:$0x1]  ;;  %v1319_v54 = vrot.slane %v1270_v42, 3  ;;  %v1096_v42 = vld [vmem:[%s2668_s1 + $0x3e] sm:$0x1] }
  0x9d   :  { %v1791_v57 = vadd.f32 %v1442_v55, %v293_v56  ;;  %v377_v56 = vld [vmem:[%s2669_s0 + $0x2] sm:$0x1]  ;;  %v1317_v53 = vrot.slane %v1269_v41, 4 }
  0x9f   :  { %v297_v58 = vsel %vm92_vm7, %v1791_v57, -inf }
  0xa0   :  { %298 = vmax.xlane.f32.xlu1 %v297_v58  ;;  %v1458_v58 = vld [vmem:[%s2670_s3 + $0x28] sm:$0xff] }
 0x106   :  { %v122_v59 = vpop.xlane.xlu0 %121 }
 0x107   :  { %v123_v60 = vsub.f32 %v1656_v27, %v122_v59  ;;  %v33_v27 = vld [vmem:[%s2671_s2] sm:$0x1]  ;;  %v740_v59 = vld [vmem:[%s2668_s1 + $0x1c] sm:$0x1] }
 0x108   :  { %v140_v7 = vsel %vm50_vm0, %v139_v2, %v33_v27  ;;  %v410_v2 = vsel %vm50_vm0, %v409_v48, %v377_v56  ;;  %v381_v27 = vld [vmem:[%s2669_s0 + $0x22] sm:$0x1]  ;;  %v787_v4 = vrot.slane %v740_v59, 5  ;;  %v1093_v56 = vld [vmem:[%s2668_s1 + $0x26] sm:$0x1] }
 0x109   :  { %v124_v61 = vmul.f32 1.442695, %v123_v60  ;;  %v142_v13 = vsel %vm53_vm1, %v141_v9, %v140_v7  ;;  %v785_v60 = vrot.slane %v739_v49, 6  ;;  %v1911_v7 = vld [vmem:[%s2669_s0 + $0x32] sm:$0x1]  ;;  %v415_v15 = vrot.slane %v381_v27, 4 }
 0x10a   :  { %v144_v16 = vsel %vm56_vm2, %v143_v10, %v142_v13  ;;  %v412_v10 = vsel %vm53_vm1, %v411_v0, %v410_v2  ;;  %v1090_v13 = vld [vmem:[%s2668_s1 + $0xe] sm:$0x1]  ;;  %v419_v18 = vrot.slane %v1911_v7, 2  ;;  %v1450_v49 = vld [vmem:[%s2670_s3 + $0x18] sm:$0xff]  ;;  %v795_v27 = vrot.slane %v744_v38, 1 }
 0x10b   :  { %1468 = vpow2.f32 %v124_v61  ;;  %v146_v21 = vsel %vm59_vm3, %v145_v11, %v144_v16  ;;  %v786_v9 = vsel %vm53_vm1, %v785_v60, %v784_v1  ;;  %v742_v11 = vld [vmem:[%s2668_s1 + $0x2c] sm:$0x1]  ;;  %v789_v16 = vrot.slane %v741_v3, 4 }
 0x10c   :  { %v148_v25 = vsel %vm62_vm4, %v147_v12, %v146_v21  ;;  %v743_v12 = vld [vmem:[%s2668_s1 + $0x34] sm:$0x1]  ;;  %v788_v19 = vsel %vm56_vm2, %v787_v4, %v786_v9  ;;  %v1091_v21 = vld [vmem:[%s2668_s1 + $0x16] sm:$0x1]  ;;  %v1135_v22 = vrot.slane %v1090_v13, 7  ;;  %v791_v24 = vrot.slane %v742_v11, 3 }
 0x10d   :  { %v150_v30 = vsel %vm65_vm5, %v149_v14, %v148_v25  ;;  %v645_v14 = vmul.f32 0.35355338, %v642_v20  ;;  %v793_v25 = vrot.slane %v743_v12, 2  ;;  %v730_v20 = vld [vmem:[%s2669_s0 + $0xc] sm:$0x1]  ;;  %v790_v31 = vsel %vm59_vm3, %v789_v16, %v788_v19 }
 0x10e   :  { %v152_v34 = vsel %vm68_vm6, %v151_v17, %v150_v30  ;;  %v417_v17 = vrot.slane %v1906_v6, 3  ;;  %v1266_v30 = vld [vmem:[%s2668_s1 + $0xf] sm:$0x1]  ;;  %v1137_v32 = vrot.slane %v1091_v21, 6  ;;  %v1136_v40 = vsel %vm50_vm0, %v1135_v22, %v1089_v26  ;;  %v1095_v13 = vld [vmem:[%s2668_s1 + $0x36] sm:$0x1] }
 0x10f   :  { %172 = vmatpush.msra.mxu1 %v152_v34  ;;  %v1268_v34 = vld [vmem:[%s2668_s1 + $0x1f] sm:$0x1]  ;;  %v1311_v35 = vrot.slane %v1266_v30, 7  ;;  %v761_v44 = vrot.slane %v730_v20, 7  ;;  %v792_v50 = vsel %vm62_vm4, %v791_v24, %v790_v31  ;;  %v1321_v60 = vrot.slane %v1271_v43, 2 }
 0x110   :  { %v1315_v48 = vrot.slane %v1268_v34, 5  ;;  %v1998_v2 = vadd.f32 %v1450_v49, %v645_v14  ;;  %v763_v3 = vrot.slane %v1962_v39, 6  ;;  %v794_v9 = vsel %vm65_vm5, %v793_v25, %v792_v50  ;;  %v1257_v16 = vld [vmem:[%s2669_s0 + $0x7] sm:$0x1]  ;;  %v1258_v19 = vld [vmem:[%s2669_s0 + $0xf] sm:$0x1] }
 0x111   :  { %v1796_v62 = vpop.eup %1468  ;;  %1444 = vmatpush.xpose.msk.msrb.mxu1 %vm92_vm7, %v444_v45  ;;  %v1272_v45 = vld [vmem:[%s2668_s1 + $0x3f] sm:$0x1]  ;;  %v1312_v46 = vsel %vm50_vm0, %v1311_v35, %v1265_v29  ;;  %v1259_v21 = vld [vmem:[%s2669_s0 + $0x17] sm:$0x1]  ;;  %v1261_v20 = vld [vmem:[%s2669_s0 + $0x27] sm:$0x1]  ;;  %v796_v29 = vsel %vm68_vm6, %v795_v27, %v794_v9 }
 0x112   :  { %v126_v63 = vsel %vm92_vm7, %v1796_v62, 0.0  ;;  %v1323_v1 = vrot.slane %v1272_v45, 1  ;;  %v649_v12 = vsel %vm92_vm7, %v1998_v2, -inf  ;;  %v1260_v25 = vld [vmem:[%s2669_s0 + $0x1f] sm:$0x1]  ;;  %v1289_v26 = vrot.slane %v1258_v19, 7 }
 0x113   :  { %127 = vadd.xlane.f32.xlu0 %v126_v63  ;;  %v299_v52 = vpop.xlane.xlu1 %298  ;;  %650 = vmax.xlane.f32.xlu2 %v649_v12  ;;  %v1082_v30 = vld [vmem:[%s2669_s0 + $0xe] sm:$0x1]  ;;  %v1262_v31 = vld [vmem:[%s2669_s0 + $0x2f] sm:$0x1]  ;;  %v733_v6 = vld [vmem:[%s2669_s0 + $0x24] sm:$0x1] }
 0x114   :  { %v300_v55 = vsub.f32 %v1791_v57, %v299_v52  ;;  %v380_v57 = vld [vmem:[%s2669_s0 + $0x1a] sm:$0x1]  ;;  %v1139_v52 = vrot.slane %v1092_v28, 5  ;;  %v1264_v34 = vld [vmem:[%s2669_s0 + $0x3f] sm:$0x1]  ;;  %v1290_v35 = vsel %vm50_vm0, %v1289_v26, %v1257_v16  ;;  %v1293_v38 = vrot.slane %v1260_v25, 5 }
 0x115   :  { %v413_v8 = vrot.slane %v380_v57, 5  ;;  %v729_v57 = vld [vmem:[%s2669_s0 + $0x4] sm:$0x1]  ;;  %v1295_v43 = vrot.slane %v1261_v20, 4  ;;  %v1145_v45 = vrot.slane %v1095_v13, 2  ;;  %v767_v50 = vrot.slane %v733_v6, 4 }
 0x116   :  { %v301_v63 = vmul.f32 1.442695, %v300_v55  ;;  %v762_v22 = vsel %vm50_vm0, %v761_v44, %v729_v57  ;;  %v1297_v44 = vrot.slane %v1262_v31, 3  ;;  %v734_v49 = vld [vmem:[%s2669_s0 + $0x2c] sm:$0x1] }
 0x117   :  { %v414_v23 = vsel %vm56_vm2, %v413_v8, %v412_v10  ;;  %v1141_v10 = vrot.slane %v1093_v56, 4  ;;  %v764_v41 = vsel %vm53_vm1, %v763_v3, %v762_v22  ;;  %v769_v27 = vrot.slane %v734_v49, 3  ;;  %v1085_v9 = vld [vmem:[%s2669_s0 + $0x26] sm:$0x1]  ;;  %v1086_v16 = vld [vmem:[%s2669_s0 + $0x2e] sm:$0x1] }
 0x118   :  { %v994_v47 = vpop.f32.mrf.mxu0  ;;  %1470 = vpow2.f32 %v301_v63  ;;  %v416_v37 = vsel %vm59_vm3, %v415_v15, %v414_v23  ;;  %v1119_v19 = vrot.slane %v1085_v9, 4  ;;  %v1121_v25 = vrot.slane %v1086_v16, 3  ;;  %v1454_v9 = vld [vmem:[%s2670_s3 + $0x20] sm:$0xff]  ;;  %v1466_v16 = vld [vmem:[%s2670_s3 + $0x38] sm:$0xff] }
 0x119   :  { %v997_v51 = vmul.f32 0.35355338, %v994_v47  ;;  %v1313_v47 = vrot.slane %v1267_v33, 6  ;;  %v418_v28 = vsel %vm62_vm4, %v417_v17, %v416_v37  ;;  %v1291_v37 = vrot.slane %v1259_v21, 6 }
 0x11b   :  { %v1888_v61 = vadd.f32 %v1458_v58, %v997_v51  ;;  %v1985_v51 = vld [vmem:[%s2669_s0 + $0x1c] sm:$0x1]  ;;  %v1138_v58 = vsel %vm53_vm1, %v1137_v32, %v1136_v40  ;;  %v1314_v59 = vsel %vm53_vm1, %v1313_v47, %v1312_v46  ;;  %v1263_v32 = vld [vmem:[%s2669_s0 + $0x37] sm:$0x1]  ;;  %v384_v40 = vld [vmem:[%s2669_s0 + $0x3a] sm:$0x1] }
 0x11c   :  { %v1316_v0 = vsel %vm56_vm2, %v1315_v48, %v1314_v59  ;;  %v765_v4 = vrot.slane %v1985_v51, 5  ;;  %v1140_v14 = vsel %vm56_vm2, %v1139_v52, %v1138_v58  ;;  %v1083_v46 = vld [vmem:[%s2669_s0 + $0x16] sm:$0x1]  ;;  %v1113_v47 = vrot.slane %v1082_v30, 7  ;;  %v1081_v52 = vld [vmem:[%s2669_s0 + $0x6] sm:$0x1] }
 0x11d   :  { %v1001_v5 = vsel %vm92_vm7, %v1888_v61, -inf  ;;  %v1318_v8 = vsel %vm59_vm3, %v1317_v53, %v1316_v0  ;;  %v1142_v17 = vsel %vm59_vm3, %v1141_v10, %v1140_v14  ;;  %v1299_v48 = vrot.slane %v1263_v32, 2 }
 0x11e   :  { %1002 = vmax.xlane.f32.xlu0 %v1001_v5  ;;  %v1953_v36 = vpop.eup %1470  ;;  %v1094_v5 = vld [vmem:[%s2668_s1 + $0x2e] sm:$0x1]  ;;  %v1320_v11 = vsel %vm62_vm4, %v1319_v54, %v1318_v8  ;;  %v1301_v54 = vrot.slane %v1264_v34, 1  ;;  %v766_v56 = vsel %vm56_vm2, %v765_v4, %v764_v41  ;;  %v420_v59 = vsel %vm65_vm5, %v419_v18, %v418_v28  ;;  %v1088_v28 = vld [vmem:[%s2669_s0 + $0x3e] sm:$0x1] }
 0x11f   :  { %v303_v63 = vsel %vm92_vm7, %v1953_v36, 0.0  ;;  %v1322_v15 = vsel %vm65_vm5, %v1321_v60, %v1320_v11  ;;  %v1143_v23 = vrot.slane %v1094_v5, 3  ;;  %v1147_v60 = vrot.slane %v1096_v42, 1  ;;  %v736_v11 = vld [vmem:[%s2669_s0 + $0x3c] sm:$0x1] }
 0x120   :  { %v1324_v24 = vsel %vm68_vm6, %v1323_v1, %v1322_v15  ;;  %v1115_v57 = vrot.slane %v1083_v46, 6  ;;  %v735_v1 = vld [vmem:[%s2669_s0 + $0x34] sm:$0x1]  ;;  %v1114_v4 = vsel %vm50_vm0, %v1113_v47, %v1081_v52  ;;  %v768_v18 = vsel %vm59_vm3, %v767_v50, %v766_v56  ;;  %v221_v41 = vld [vmem:[%s2671_s2 + $0x21] sm:$0x1] }
 0x121   :  { %1464 = vmatpush.xpose.msk.msrb.mxu0 %vm92_vm7, %v1324_v24  ;;  %v1144_v51 = vsel %vm62_vm4, %v1143_v23, %v1142_v17  ;;  %v771_v12 = vrot.slane %v735_v1, 2  ;;  %v770_v15 = vsel %vm62_vm4, %v769_v27, %v768_v18  ;;  %v773_v21 = vrot.slane %v736_v11, 1  ;;  %v1087_v24 = vld [vmem:[%s2669_s0 + $0x36] sm:$0x1]  ;;  %v218_v17 = vld [vmem:[%s2671_s2 + $0x9] sm:$0x1] }
 0x122   :  { %v1146_v3 = vsel %vm65_vm5, %v1145_v45, %v1144_v51  ;;  %v1116_v14 = vsel %vm53_vm1, %v1115_v57, %v1114_v4  ;;  %v1125_v31 = vrot.slane %v1088_v28, 1  ;;  %v223_v45 = vld [vmem:[%s2671_s2 + $0x31] sm:$0x1]  ;;  %v224_v46 = vld [vmem:[%s2671_s2 + $0x39] sm:$0x1] }
 0x123   :  { %v1148_v13 = vsel %vm68_vm6, %v1147_v60, %v1146_v3  ;;  %v772_v23 = vsel %vm65_vm5, %v771_v12, %v770_v15  ;;  %v326_v50 = vrot.slane %v223_v45, 2  ;;  %v328_v51 = vrot.slane %v224_v46, 1  ;;  %v1446_v4 = vld [vmem:[%s2670_s3 + $0x10] sm:$0xff] }
 0x124   :  { %v774_v26 = vsel %vm68_vm6, %v773_v21, %v772_v23  ;;  %v575_v46 = vld [vmem:[%s2671_s2 + $0x33] sm:$0x1] }
 0x126   :  { %304 = vadd.xlane.f32.xlu0 %v303_v63  ;;  %v1084_v63 = vld [vmem:[%s2669_s0 + $0x1e] sm:$0x1] }
 0x127   :  { %v1117_v10 = vrot.slane %v1084_v63, 5 }
 0x129   :  { %v1118_v22 = vsel %vm56_vm2, %v1117_v10, %v1116_v14 }
 0x12a   :  { %v1120_v20 = vsel %vm59_vm3, %v1119_v19, %v1118_v22 }
 0x12b   :  { %v1122_v30 = vsel %vm62_vm4, %v1121_v25, %v1120_v20 }
 0x186   :  { %v128_v55 = vpop.xlane.xlu0 %127  ;;  %v651_v11 = vpop.xlane.xlu2 %650 }
 0x187   :  { %1472 = vrcp.f32 %v128_v55  ;;  %v421_v55 = vrot.slane %v384_v40, 1  ;;  %v652_v15 = vsub.f32 %v1998_v2, %v651_v11 }
 0x189   :  { %v422_v8 = vsel %vm68_vm6, %v421_v55, %v420_v59  ;;  %v653_v22 = vmul.f32 1.442695, %v652_v15 }
 0x18d   :  { %v1473_v33 = vpop.eup %1472 }
 0x18e   :  { %v130_v39 = vmul.f32 %v1473_v33, %v1796_v62  ;;  %v1292_v62 = vsel %vm53_vm1, %v1291_v37, %v1290_v35  ;;  %v219_v35 = vld [vmem:[%s2671_s2 + $0x11] sm:$0x1]  ;;  %v316_v37 = vrot.slane %v218_v17, 7 }
 0x18f   :  { %v1294_v53 = vsel %vm56_vm2, %v1293_v38, %v1292_v62  ;;  %v217_v38 = vld [vmem:[%s2671_s2 + $0x1] sm:$0x1]  ;;  %v318_v40 = vrot.slane %v219_v35, 6 }
 0x190   :  { %1439 = vmatmul.msk.f32.vlgmr.msra.gmra.mxu1 %vm92_vm7, %v130_v39  ;;  %v1296_v58 = vsel %vm59_vm3, %v1295_v43, %v1294_v53  ;;  %v220_v39 = vld [vmem:[%s2671_s2 + $0x19] sm:$0x1]  ;;  %v317_v42 = vsel %vm50_vm0, %v316_v37, %v217_v38  ;;  %v570_v38 = vld [vmem:[%s2671_s2 + $0xb] sm:$0x1] }
 0x191   :  { %1452 = vmatpush.xpose.msk.msra.mxu1 %vm92_vm7, %v796_v29  ;;  %v1298_v0 = vsel %vm62_vm4, %v1297_v44, %v1296_v58  ;;  %v1123_v29 = vrot.slane %v1087_v24, 2  ;;  %v2124_v6 = vpop.xlane.xlu0 %1002  ;;  %v320_v43 = vrot.slane %v220_v39, 5  ;;  %v222_v44 = vld [vmem:[%s2671_s2 + $0x29] sm:$0x1]  ;;  %v319_v47 = vsel %vm53_vm1, %v318_v40, %v317_v42  ;;  %v1462_v24 = vld [vmem:[%s2670_s3 + $0x30] sm:$0xff] }
 0x192   :  { %v1300_v7 = vsel %vm65_vm5, %v1299_v48, %v1298_v0  ;;  %v322_v48 = vrot.slane %v221_v41, 4  ;;  %v324_v49 = vrot.slane %v222_v44, 3  ;;  %v571_v39 = vld [vmem:[%s2671_s2 + $0x13] sm:$0x1]  ;;  %v572_v40 = vld [vmem:[%s2671_s2 + $0x1b] sm:$0x1] }
 0x193   :  { %v1302_v5 = vsel %vm68_vm6, %v1301_v54, %v1300_v7  ;;  %v1124_v32 = vsel %vm65_vm5, %v1123_v29, %v1122_v30  ;;  %v321_v62 = vsel %vm56_vm2, %v320_v43, %v319_v47  ;;  %v573_v41 = vld [vmem:[%s2671_s2 + $0x23] sm:$0x1]  ;;  %v574_v44 = vld [vmem:[%s2671_s2 + $0x2b] sm:$0x1]  ;;  %v668_v47 = vrot.slane %v570_v38, 7 }
 0x194   :  { %1465 = vmatmul.msk.f32.vlgmr.msrb.gmra.mxu0 %vm92_vm7, %v1302_v5  ;;  %v1126_v33 = vsel %vm68_vm6, %v1125_v31, %v1124_v32  ;;  %v323_v52 = vsel %vm59_vm3, %v322_v48, %v321_v62  ;;  %v569_v43 = vld [vmem:[%s2671_s2 + $0x3] sm:$0x1]  ;;  %v670_v62 = vrot.slane %v571_v39, 6  ;;  %v576_v48 = vld [vmem:[%s2671_s2 + $0x3b] sm:$0x1] }
 0x195   :  { %v325_v54 = vsel %vm62_vm4, %v324_v49, %v323_v52  ;;  %v672_v49 = vrot.slane %v572_v40, 5 }
 0x196   :  { %v327_v55 = vsel %vm65_vm5, %v326_v50, %v325_v54  ;;  %v674_v50 = vrot.slane %v573_v41, 4  ;;  %v676_v54 = vrot.slane %v574_v44, 3 }
 0x197   :  { %v329_v58 = vsel %vm68_vm6, %v328_v51, %v327_v55  ;;  %v1004_v51 = vsub.f32 %v1888_v61, %v2124_v6  ;;  %v680_v6 = vrot.slane %v576_v48, 1  ;;  %v923_v48 = vld [vmem:[%s2671_s2 + $0x15] sm:$0x1] }
 0x198   :  { %1445 = vmatmul.msk.f32.vlgmr.msrb.gmra.mxu1 %vm92_vm7, %v422_v8  ;;  %349 = vmatpush.msra.mxu3 %v329_v58 }
 0x199   :  { %1460 = vmatpush.xpose.msk.msrb.mxu1 %vm92_vm7, %v1148_v13  ;;  %v305_v34 = vpop.xlane.xlu0 %304 }
 0x19a   :  { %1474 = vrcp.f32 %v305_v34 }
 0x19b   :  { %1476 = vpow2.f32 %v653_v22 }
 0x1a0   :  { %1453 = vmatmul.msk.f32.vlgmr.msra.gmra.mxu1 %vm92_vm7, %v774_v26  ;;  %v1475_v53 = vpop.eup %1474 }
 0x1a1   :  { %v307_v56 = vmul.f32 %v1475_v53, %v1953_v36  ;;  %v2217_v28 = vpop.eup %1476  ;;  %v669_v53 = vsel %vm50_vm0, %v668_v47, %v569_v43  ;;  %v747_v47 = vld [vmem:[%s2671_s2 + $0x14] sm:$0x1] }
 0x1a2   :  { %v655_v29 = vsel %vm92_vm7, %v2217_v28, 0.0  ;;  %v671_v55 = vsel %vm53_vm1, %v670_v62, %v669_v53  ;;  %v1022_v53 = vrot.slane %v923_v48, 6  ;;  %v1277_v48 = vld [vmem:[%s2671_s2 + $0x27] sm:$0x1] }
 0x1a3   :  { %1443 = vmatmul.msk.f32.vlgmr.msra.gmra.mxu3 %vm92_vm7, %v307_v56  ;;  %v678_v56 = vrot.slane %v575_v46, 2  ;;  %v673_v61 = vsel %vm56_vm2, %v672_v49, %v671_v55  ;;  %v922_v46 = vld [vmem:[%s2671_s2 + $0xd] sm:$0x1] }
 0x1a4   :  { %v675_v58 = vsel %vm59_vm3, %v674_v50, %v673_v61  ;;  %v1020_v49 = vrot.slane %v922_v46, 7  ;;  %v745_v50 = vld [vmem:[%s2671_s2 + $0x4] sm:$0x1]  ;;  %v921_v61 = vld [vmem:[%s2671_s2 + $0x5] sm:$0x1] }
 0x1a5   :  { %v1102_v46 = vld [vmem:[%s2671_s2 + $0x2e] sm:$0x1] }
 0x1a8   :  { %1461 = vmatmul.msk.f32.vlgmr.msrb.gmra.mxu1 %vm92_vm7, %v1126_v33 }
 0x20d   :  { %v174_v59 = vpop.f32.mrf.mxu1 }
 0x20e   :  { %v178_v60 = vrot.slane %v174_v59, 1  ;;  %v179_v63 = vrot.slane %v174_v59, 2  ;;  %v180_v57 = vrot.slane %v174_v59, 3  ;;  %193 = vst.msk [vmem:[%s2672_s4] sm:$0x1] %vm192_vm8, %v174_v59  ;;  %v181_v0 = vrot.slane %v174_v59, 4 }
 0x20f   :  { %v182_v1 = vrot.slane %v174_v59, 5  ;;  %v183_v36 = vrot.slane %v174_v59, 6  ;;  %v184_v27 = vrot.slane %v174_v59, 7  ;;  %v1005_v59 = vmul.f32 1.442695, %v1004_v51 }
 0x210   :  { %194 = vst.msk [vmem:[%s2672_s4 + $0x8] sm:$0x1] %vm192_vm8, %v178_v60  ;;  %v677_v60 = vsel %vm62_vm4, %v676_v54, %v675_v58  ;;  %v748_v51 = vld [vmem:[%s2671_s2 + $0x1c] sm:$0x1]  ;;  %v749_v54 = vld [vmem:[%s2671_s2 + $0x24] sm:$0x1] }
 0x211   :  { %195 = vst.msk [vmem:[%s2672_s4 + $0x10] sm:$0x1] %vm192_vm8, %v179_v63  ;;  %v1346_v10 = vpop.f32.mrf.mxu0  ;;  %v751_v58 = vld [vmem:[%s2671_s2 + $0x34] sm:$0x1] }
 0x212   :  { %196 = vst.msk [vmem:[%s2672_s4 + $0x18] sm:$0x1] %vm192_vm8, %v180_v57  ;;  %v1349_v14 = vmul.f32 0.35355338, %v1346_v10  ;;  %v679_v57 = vsel %vm65_vm5, %v678_v56, %v677_v60  ;;  %v848_v56 = vrot.slane %v748_v51, 5 }
 0x213   :  { %197 = vst.msk [vmem:[%s2672_s4 + $0x20] sm:$0x1] %vm192_vm8, %v181_v0 }
 0x214   :  { %198 = vst.msk [vmem:[%s2672_s4 + $0x28] sm:$0x1] %vm192_vm8, %v182_v1  ;;  %v2206_v21 = vadd.f32 %v1466_v16, %v1349_v14  ;;  %v681_v1 = vsel %vm68_vm6, %v680_v6, %v679_v57  ;;  %v750_v6 = vld [vmem:[%s2671_s2 + $0x2c] sm:$0x1] }
 0x215   :  { %199 = vst.msk [vmem:[%s2672_s4 + $0x30] sm:$0x1] %vm192_vm8, %v183_v36  ;;  %v466_v3 = vpop.f32.mrf.mxu1  ;;  %701 = vmatpush.msrb.mxu2 %v681_v1  ;;  %v852_v1 = vrot.slane %v750_v6, 3 }
 0x216   :  { %200 = vst.msk [vmem:[%s2672_s4 + $0x38] sm:$0x1] %vm192_vm8, %v184_v27  ;;  %v469_v7 = vmul.f32 0.35355338, %v466_v3  ;;  %v1353_v2 = vsel %vm92_vm7, %v2206_v21, -inf }
 0x218   :  { %v472_v18 = vadd.f32 %v1446_v4, %v469_v7 }
 0x21a   :  { %v473_v5 = vsel %vm92_vm7, %v472_v18, -inf }
 0x21b   :  { %474 = vmax.xlane.f32.xlu1 %v473_v5 }
 0x21d   :  { %v818_v8 = vpop.f32.mrf.mxu1 }
 0x21e   :  { %v821_v12 = vmul.f32 0.35355338, %v818_v8 }
 0x220   :  { %v2198_v13 = vadd.f32 %v1454_v9, %v821_v12 }
 0x222   :  { %v825_v19 = vsel %vm92_vm7, %v2198_v13, -inf }
 0x223   :  { %826 = vmax.xlane.f32.xlu2 %v825_v19 }
 0x225   :  { %v1170_v23 = vpop.f32.mrf.mxu1 }
 0x226   :  { %v1173_v25 = vmul.f32 0.35355338, %v1170_v23  ;;  %v351_v30 = vpop.f32.mrf.mxu3 }
 0x227   :  { %v355_v31 = vrot.slane %v351_v30, 1  ;;  %v356_v32 = vrot.slane %v351_v30, 2  ;;  %v357_v33 = vrot.slane %v351_v30, 3  ;;  %369 = vst.msk [vmem:[%s2672_s4 + $0x1] sm:$0x1] %vm192_vm8, %v351_v30  ;;  %v358_v17 = vrot.slane %v351_v30, 4 }
 0x228   :  { %v2211_v20 = vadd.f32 %v1462_v24, %v1173_v25  ;;  %v359_v34 = vrot.slane %v351_v30, 5  ;;  %v360_v35 = vrot.slane %v351_v30, 6  ;;  %v361_v37 = vrot.slane %v351_v30, 7  ;;  %v393_v24 = vld [vmem:[%s2671_s2 + $0x2] sm:$0x1] }
 0x229   :  { %370 = vst.msk [vmem:[%s2672_s4 + $0x9] sm:$0x1] %vm192_vm8, %v355_v31  ;;  %v394_v25 = vld [vmem:[%s2671_s2 + $0xa] sm:$0x1] }
 0x22a   :  { %v1177_v26 = vsel %vm92_vm7, %v2211_v20, -inf  ;;  %371 = vst.msk [vmem:[%s2672_s4 + $0x11] sm:$0x1] %vm192_vm8, %v356_v32  ;;  %v492_v30 = vrot.slane %v394_v25, 7  ;;  %v400_v32 = vld [vmem:[%s2671_s2 + $0x3a] sm:$0x1] }
 0x22b   :  { %1354 = vmax.xlane.f32.xlu2 %v1353_v2  ;;  %1178 = vmax.xlane.f32.xlu1 %v1177_v26  ;;  %372 = vst.msk [vmem:[%s2672_s4 + $0x19] sm:$0x1] %vm192_vm8, %v357_v33  ;;  %v396_v2 = vld [vmem:[%s2671_s2 + $0x1a] sm:$0x1]  ;;  %v397_v26 = vld [vmem:[%s2671_s2 + $0x22] sm:$0x1] }
 0x22c   :  { %373 = vst.msk [vmem:[%s2672_s4 + $0x21] sm:$0x1] %vm192_vm8, %v358_v17  ;;  %v496_v33 = vrot.slane %v396_v2, 5  ;;  %v498_v17 = vrot.slane %v397_v26, 4  ;;  %v504_v40 = vrot.slane %v400_v32, 1 }
 0x22d   :  { %374 = vst.msk [vmem:[%s2672_s4 + $0x29] sm:$0x1] %vm192_vm8, %v359_v34  ;;  %v493_v34 = vsel %vm50_vm0, %v492_v30, %v393_v24  ;;  %v1098_v25 = vld [vmem:[%s2671_s2 + $0xe] sm:$0x1]  ;;  %v1275_v30 = vld [vmem:[%s2671_s2 + $0x17] sm:$0x1] }
 0x22e   :  { %375 = vst.msk [vmem:[%s2672_s4 + $0x31] sm:$0x1] %vm192_vm8, %v360_v35 }
 0x22f   :  { %376 = vst.msk [vmem:[%s2672_s4 + $0x39] sm:$0x1] %vm192_vm8, %v361_v37 }
 0x233   :  { %656 = vadd.xlane.f32.xlu2 %v655_v29  ;;  %v399_v29 = vld [vmem:[%s2671_s2 + $0x32] sm:$0x1] }
 0x234   :  { %v502_v38 = vrot.slane %v399_v29, 2  ;;  %v1196_v29 = vrot.slane %v1098_v25, 7 }
 0x28e   :  { %v475_v42 = vpop.xlane.xlu1 %474 }
 0x28f   :  { %v476_v45 = vsub.f32 %v472_v18, %v475_v42 }
 0x291   :  { %v477_v52 = vmul.f32 1.442695, %v476_v45  ;;  %v746_v45 = vld [vmem:[%s2671_s2 + $0xc] sm:$0x1] }
 0x292   :  { %v844_v62 = vrot.slane %v746_v45, 7 }
 0x293   :  { %1478 = vpow2.f32 %v477_v52  ;;  %v846_v52 = vrot.slane %v747_v47, 6  ;;  %v1276_v47 = vld [vmem:[%s2671_s2 + $0x1f] sm:$0x1] }
 0x294   :  { %1480 = vpow2.f32 %v1005_v59  ;;  %v845_v55 = vsel %vm50_vm0, %v844_v62, %v745_v50  ;;  %v752_v59 = vld [vmem:[%s2671_s2 + $0x3c] sm:$0x1]  ;;  %v1376_v51 = vrot.slane %v1276_v47, 5 }
 0x295   :  { %v847_v60 = vsel %vm53_vm1, %v846_v52, %v845_v55  ;;  %v1378_v55 = vrot.slane %v1277_v48, 4 }
 0x296   :  { %v827_v63 = vpop.xlane.xlu2 %826  ;;  %v849_v57 = vsel %vm56_vm2, %v848_v56, %v847_v60  ;;  %v1204_v60 = vrot.slane %v1102_v46, 3 }
 0x297   :  { %v828_v0 = vsub.f32 %v2198_v13, %v827_v63  ;;  %v1021_v63 = vsel %vm50_vm0, %v1020_v49, %v921_v61  ;;  %v1278_v49 = vld [vmem:[%s2671_s2 + $0x2f] sm:$0x1] }
 0x298   :  { %v1380_v56 = vrot.slane %v1278_v49, 3 }
 0x299   :  { %v2287_v36 = vpop.eup %1478  ;;  %v829_v27 = vmul.f32 1.442695, %v828_v0  ;;  %v850_v0 = vrot.slane %v749_v54, 4  ;;  %v1280_v54 = vld [vmem:[%s2671_s2 + $0x3f] sm:$0x1] }
 0x29a   :  { %v479_v3 = vsel %vm92_vm7, %v2287_v36, 0.0  ;;  %v2291_v18 = vpop.eup %1480 }
 0x29b   :  { %1482 = vpow2.f32 %v829_v27  ;;  %480 = vadd.xlane.f32.xlu1 %v479_v3  ;;  %v1007_v13 = vsel %vm92_vm7, %v2291_v18, 0.0  ;;  %v854_v27 = vrot.slane %v751_v58, 2  ;;  %v924_v3 = vld [vmem:[%s2671_s2 + $0x1d] sm:$0x1]  ;;  %v1384_v58 = vrot.slane %v1280_v54, 1 }
 0x29e   :  { %v1355_v4 = vpop.xlane.xlu2 %1354  ;;  %v1179_v7 = vpop.xlane.xlu1 %1178 }
 0x29f   :  { %v1356_v5 = vsub.f32 %v2206_v21, %v1355_v4  ;;  %v1180_v8 = vsub.f32 %v2211_v20, %v1179_v7  ;;  %v395_v20 = vld [vmem:[%s2671_s2 + $0x12] sm:$0x1]  ;;  %v856_v4 = vrot.slane %v752_v59, 1  ;;  %v925_v7 = vld [vmem:[%s2671_s2 + $0x25] sm:$0x1] }
 0x2a0   :  { %v494_v31 = vrot.slane %v395_v20, 6  ;;  %v1274_v20 = vld [vmem:[%s2671_s2 + $0xf] sm:$0x1]  ;;  %v1103_v59 = vld [vmem:[%s2671_s2 + $0x36] sm:$0x1] }
 0x2a1   :  { %v2295_v9 = vpop.eup %1482  ;;  %v1357_v10 = vmul.f32 1.442695, %v1356_v5  ;;  %v1181_v11 = vmul.f32 1.442695, %v1180_v8  ;;  %v926_v5 = vld [vmem:[%s2671_s2 + $0x2d] sm:$0x1]  ;;  %v1023_v8 = vsel %vm53_vm1, %v1022_v53, %v1021_v63 }
 0x2a2   :  { %v831_v12 = vsel %vm92_vm7, %v2295_v9, 0.0  ;;  %v495_v37 = vsel %vm53_vm1, %v494_v31, %v493_v34  ;;  %v1372_v31 = vrot.slane %v1274_v20, 7  ;;  %v1100_v34 = vld [vmem:[%s2671_s2 + $0x1e] sm:$0x1]  ;;  %v1279_v53 = vld [vmem:[%s2671_s2 + $0x37] sm:$0x1] }
 0x2a3   :  { %1484 = vpow2.f32 %v1357_v10  ;;  %832 = vadd.xlane.f32.xlu0 %v831_v12  ;;  %1008 = vadd.xlane.f32.xlu1 %v1007_v13  ;;  %v497_v39 = vsel %vm56_vm2, %v496_v33, %v495_v37  ;;  %v1024_v10 = vrot.slane %v924_v3, 5  ;;  %v927_v12 = vld [vmem:[%s2671_s2 + $0x35] sm:$0x1]  ;;  %v928_v13 = vld [vmem:[%s2671_s2 + $0x3d] sm:$0x1]  ;;  %v1374_v37 = vrot.slane %v1275_v30, 6 }
 0x2a4   :  { %1486 = vpow2.f32 %v1181_v11  ;;  %v499_v41 = vsel %vm59_vm3, %v498_v17, %v497_v39  ;;  %v851_v11 = vsel %vm59_vm3, %v850_v0, %v849_v57  ;;  %v1032_v24 = vrot.slane %v928_v13, 1  ;;  %v1097_v17 = vld [vmem:[%s2671_s2 + $0x6] sm:$0x1]  ;;  %v1104_v3 = vld [vmem:[%s2671_s2 + $0x3e] sm:$0x1] }
 0x2a5   :  { %v1101_v39 = vld [vmem:[%s2671_s2 + $0x26] sm:$0x1]  ;;  %v1382_v6 = vrot.slane %v1279_v53, 2 }
 0x2a6   :  { %v657_v14 = vpop.xlane.xlu2 %656  ;;  %v1202_v62 = vrot.slane %v1101_v39, 4 }
 0x2a7   :  { %1488 = vrcp.f32 %v657_v14  ;;  %v1026_v14 = vrot.slane %v925_v7, 4 }
 0x2a9   :  { %v2301_v15 = vpop.eup %1484 }
 0x2aa   :  { %v2303_v16 = vpop.eup %1486  ;;  %v1359_v19 = vsel %vm92_vm7, %v2301_v15, 0.0 }
 0x2ab   :  { %1360 = vadd.xlane.f32.xlu0 %v1359_v19  ;;  %v1183_v21 = vsel %vm92_vm7, %v2303_v16, 0.0  ;;  %v1028_v19 = vrot.slane %v926_v5, 3 }
 0x2ac   :  { %1184 = vadd.xlane.f32.xlu2 %v1183_v21  ;;  %v853_v21 = vsel %vm62_vm4, %v852_v1, %v851_v11 }
 0x2ad   :  { %v1489_v22 = vpop.eup %1488  ;;  %v855_v2 = vsel %vm65_vm5, %v854_v27, %v853_v21 }
 0x2ae   :  { %v659_v23 = vmul.f32 %v1489_v22, %v2217_v28  ;;  %v398_v28 = vld [vmem:[%s2671_s2 + $0x2a] sm:$0x1]  ;;  %v1025_v22 = vsel %vm56_vm2, %v1024_v10, %v1023_v8  ;;  %v857_v32 = vsel %vm68_vm6, %v856_v4, %v855_v2  ;;  %v1206_v4 = vrot.slane %v1103_v59, 2 }
 0x2af   :  { %v500_v35 = vrot.slane %v398_v28, 3  ;;  %v1027_v26 = vsel %vm59_vm3, %v1026_v14, %v1025_v22  ;;  %v1099_v28 = vld [vmem:[%s2671_s2 + $0x16] sm:$0x1]  ;;  %v1208_v8 = vrot.slane %v1104_v3, 1 }
 0x2b0   :  { %1451 = vmatmul.msk.f32.vlgmr.msrb.gmra.mxu2 %vm92_vm7, %v659_v23  ;;  %v1030_v23 = vrot.slane %v927_v12, 2  ;;  %v1029_v33 = vsel %vm62_vm4, %v1028_v19, %v1027_v26 }
 0x2b1   :  { %v501_v42 = vsel %vm62_vm4, %v500_v35, %v499_v41  ;;  %v1198_v35 = vrot.slane %v1099_v28, 6  ;;  %v1200_v41 = vrot.slane %v1100_v34, 5 }
 0x2b2   :  { %v503_v43 = vsel %vm65_vm5, %v502_v38, %v501_v42  ;;  %v1031_v38 = vsel %vm65_vm5, %v1030_v23, %v1029_v33  ;;  %v1273_v42 = vld [vmem:[%s2671_s2 + $0x7] sm:$0x1] }
 0x2b3   :  { %v505_v44 = vsel %vm68_vm6, %v504_v40, %v503_v43  ;;  %v1197_v40 = vsel %vm50_vm0, %v1196_v29, %v1097_v17  ;;  %v1033_v43 = vsel %vm68_vm6, %v1032_v24, %v1031_v38  ;;  %v1373_v45 = vsel %vm50_vm0, %v1372_v31, %v1273_v42 }
 0x2b4   :  { %525 = vmatpush.msrb.mxu3 %v505_v44  ;;  %v1199_v44 = vsel %vm53_vm1, %v1198_v35, %v1197_v40  ;;  %1053 = vmatpush.msra.mxu2 %v1033_v43  ;;  %v1375_v50 = vsel %vm53_vm1, %v1374_v37, %v1373_v45 }
 0x2b5   :  { %v1201_v52 = vsel %vm56_vm2, %v1200_v41, %v1199_v44  ;;  %v1377_v61 = vsel %vm56_vm2, %v1376_v51, %v1375_v50 }
 0x2b6   :  { %877 = vmatpush.msra.mxu3 %v857_v32  ;;  %v1379_v63 = vsel %vm59_vm3, %v1378_v55, %v1377_v61  ;;  %v1203_v57 = vsel %vm59_vm3, %v1202_v62, %v1201_v52 }
 0x2b7   :  { %v1381_v0 = vsel %vm62_vm4, %v1380_v56, %v1379_v63  ;;  %v1205_v5 = vsel %vm62_vm4, %v1204_v60, %v1203_v57 }
 0x2b8   :  { %v1383_v27 = vsel %vm65_vm5, %v1382_v6, %v1381_v0  ;;  %v1207_v10 = vsel %vm65_vm5, %v1206_v4, %v1205_v5 }
 0x2b9   :  { %v1385_v7 = vsel %vm68_vm6, %v1384_v58, %v1383_v27  ;;  %v1209_v19 = vsel %vm68_vm6, %v1208_v8, %v1207_v10 }
 0x2ba   :  { %1405 = vmatpush.msrb.mxu2 %v1385_v7 }
 0x30e   :  { %v481_v1 = vpop.xlane.xlu1 %480 }
 0x30f   :  { %1490 = vrcp.f32 %v481_v1 }
 0x315   :  { %v1491_v11 = vpop.eup %1490 }
 0x316   :  { %v1009_v12 = vpop.xlane.xlu1 %1008  ;;  %v833_v13 = vpop.xlane.xlu0 %832  ;;  %v483_v14 = vmul.f32 %v1491_v11, %v2287_v36 }
 0x317   :  { %1492 = vrcp.f32 %v1009_v12 }
 0x318   :  { %1494 = vrcp.f32 %v833_v13  ;;  %1447 = vmatmul.msk.f32.vlgmr.msrb.gmra.mxu3 %vm92_vm7, %v483_v14 }
 0x319   :  { %1229 = vmatpush.msrb.mxu3 %v1209_v19 }
 0x31d   :  { %v1493_v21 = vpop.eup %1492 }
 0x31e   :  { %v1495_v22 = vpop.eup %1494  ;;  %v1011_v23 = vmul.f32 %v1493_v21, %v2291_v18  ;;  %v1361_v24 = vpop.xlane.xlu0 %1360 }
 0x31f   :  { %v835_v25 = vmul.f32 %v1495_v22, %v2295_v9  ;;  %v1185_v20 = vpop.xlane.xlu2 %1184  ;;  %1496 = vrcp.f32 %v1361_v24 }
 0x320   :  { %1498 = vrcp.f32 %v1185_v20  ;;  %1459 = vmatmul.msk.f32.vlgmr.msra.gmra.mxu2 %vm92_vm7, %v1011_v23 }
 0x321   :  { %1455 = vmatmul.msk.f32.vlgmr.msra.gmra.mxu3 %vm92_vm7, %v835_v25 }
 0x325   :  { %v1497_v36 = vpop.eup %1496 }
 0x326   :  { %v1499_v2 = vpop.eup %1498  ;;  %v1363_v26 = vmul.f32 %v1497_v36, %v2301_v15 }
 0x327   :  { %v1187_v28 = vmul.f32 %v1499_v2, %v2303_v16 }
 0x328   :  { %1467 = vmatmul.msk.f32.vlgmr.msrb.gmra.mxu2 %vm92_vm7, %v1363_v26 }
 0x329   :  { %1463 = vmatmul.msk.f32.vlgmr.msrb.gmra.mxu3 %vm92_vm7, %v1187_v28 }
 0x333   :  { %v703_v18 = vpop.f32.mrf.mxu2 }
 0x334   :  { %v707_v29 = vrot.slane %v703_v18, 1  ;;  %v708_v9 = vrot.slane %v703_v18, 2  ;;  %v709_v30 = vrot.slane %v703_v18, 3  ;;  %721 = vst.msk [vmem:[%s2672_s4 + $0x3] sm:$0x1] %vm192_vm8, %v703_v18  ;;  %v710_v31 = vrot.slane %v703_v18, 4 }
 0x335   :  { %v711_v32 = vrot.slane %v703_v18, 5  ;;  %v712_v15 = vrot.slane %v703_v18, 6  ;;  %v713_v16 = vrot.slane %v703_v18, 7 }
 0x336   :  { %722 = vst.msk [vmem:[%s2672_s4 + $0xb] sm:$0x1] %vm192_vm8, %v707_v29 }
 0x337   :  { %723 = vst.msk [vmem:[%s2672_s4 + $0x13] sm:$0x1] %vm192_vm8, %v708_v9 }
 0x338   :  { %724 = vst.msk [vmem:[%s2672_s4 + $0x1b] sm:$0x1] %vm192_vm8, %v709_v30 }
 0x339   :  { %725 = vst.msk [vmem:[%s2672_s4 + $0x23] sm:$0x1] %vm192_vm8, %v710_v31 }
 0x33a   :  { %726 = vst.msk [vmem:[%s2672_s4 + $0x2b] sm:$0x1] %vm192_vm8, %v711_v32 }
 0x33b   :  { %727 = vst.msk [vmem:[%s2672_s4 + $0x33] sm:$0x1] %vm192_vm8, %v712_v15 }
 0x33c   :  { %728 = vst.msk [vmem:[%s2672_s4 + $0x3b] sm:$0x1] %vm192_vm8, %v713_v16 }
 0x39b   :  { %v527_v33 = vpop.f32.mrf.mxu3 }
 0x39c   :  { %v531_v17 = vrot.slane %v527_v33, 1  ;;  %v532_v34 = vrot.slane %v527_v33, 2  ;;  %v533_v35 = vrot.slane %v527_v33, 3  ;;  %545 = vst.msk [vmem:[%s2672_s4 + $0x2] sm:$0x1] %vm192_vm8, %v527_v33  ;;  %v534_v37 = vrot.slane %v527_v33, 4 }
 0x39d   :  { %v535_v38 = vrot.slane %v527_v33, 5  ;;  %v536_v39 = vrot.slane %v527_v33, 6  ;;  %v537_v40 = vrot.slane %v527_v33, 7 }
 0x39e   :  { %546 = vst.msk [vmem:[%s2672_s4 + $0xa] sm:$0x1] %vm192_vm8, %v531_v17 }
 0x39f   :  { %547 = vst.msk [vmem:[%s2672_s4 + $0x12] sm:$0x1] %vm192_vm8, %v532_v34 }
 0x3a0   :  { %548 = vst.msk [vmem:[%s2672_s4 + $0x1a] sm:$0x1] %vm192_vm8, %v533_v35 }
 0x3a1   :  { %549 = vst.msk [vmem:[%s2672_s4 + $0x22] sm:$0x1] %vm192_vm8, %v534_v37 }
 0x3a2   :  { %550 = vst.msk [vmem:[%s2672_s4 + $0x2a] sm:$0x1] %vm192_vm8, %v535_v38 }
 0x3a3   :  { %551 = vst.msk [vmem:[%s2672_s4 + $0x32] sm:$0x1] %vm192_vm8, %v536_v39  ;;  %v1055_v41 = vpop.f32.mrf.mxu2 }
 0x3a4   :  { %552 = vst.msk [vmem:[%s2672_s4 + $0x3a] sm:$0x1] %vm192_vm8, %v537_v40  ;;  %v879_v42 = vpop.f32.mrf.mxu3  ;;  %v1059_v49 = vrot.slane %v1055_v41, 1  ;;  %v1060_v50 = vrot.slane %v1055_v41, 2  ;;  %v1061_v51 = vrot.slane %v1055_v41, 3  ;;  %v1062_v52 = vrot.slane %v1055_v41, 4 }
 0x3a5   :  { %v883_v43 = vrot.slane %v879_v42, 1  ;;  %v884_v44 = vrot.slane %v879_v42, 2  ;;  %v885_v45 = vrot.slane %v879_v42, 3  ;;  %897 = vst.msk [vmem:[%s2672_s4 + $0x4] sm:$0x1] %vm192_vm8, %v879_v42  ;;  %v886_v46 = vrot.slane %v879_v42, 4 }
 0x3a6   :  { %1073 = vst.msk [vmem:[%s2672_s4 + $0x5] sm:$0x1] %vm192_vm8, %v1055_v41  ;;  %v887_v47 = vrot.slane %v879_v42, 5  ;;  %v888_v62 = vrot.slane %v879_v42, 6  ;;  %v889_v48 = vrot.slane %v879_v42, 7  ;;  %v1063_v53 = vrot.slane %v1055_v41, 5 }
 0x3a7   :  { %898 = vst.msk [vmem:[%s2672_s4 + $0xc] sm:$0x1] %vm192_vm8, %v883_v43  ;;  %v1064_v54 = vrot.slane %v1055_v41, 6  ;;  %v1065_v56 = vrot.slane %v1055_v41, 7 }
 0x3a8   :  { %899 = vst.msk [vmem:[%s2672_s4 + $0x14] sm:$0x1] %vm192_vm8, %v884_v44 }
 0x3a9   :  { %900 = vst.msk [vmem:[%s2672_s4 + $0x1c] sm:$0x1] %vm192_vm8, %v885_v45 }
 0x3aa   :  { %901 = vst.msk [vmem:[%s2672_s4 + $0x24] sm:$0x1] %vm192_vm8, %v886_v46 }
 0x3ab   :  { %902 = vst.msk [vmem:[%s2672_s4 + $0x2c] sm:$0x1] %vm192_vm8, %v887_v47  ;;  %v1407_v57 = vpop.f32.mrf.mxu2 }
 0x3ac   :  { %903 = vst.msk [vmem:[%s2672_s4 + $0x34] sm:$0x1] %vm192_vm8, %v888_v62  ;;  %v1231_v55 = vpop.f32.mrf.mxu3  ;;  %v1411_v1 = vrot.slane %v1407_v57, 1  ;;  %v1412_v27 = vrot.slane %v1407_v57, 2  ;;  %v1413_v3 = vrot.slane %v1407_v57, 3  ;;  %v1414_v4 = vrot.slane %v1407_v57, 4 }
 0x3ad   :  { %904 = vst.msk [vmem:[%s2672_s4 + $0x3c] sm:$0x1] %vm192_vm8, %v889_v48  ;;  %v1235_v61 = vrot.slane %v1231_v55, 1  ;;  %v1236_v6 = vrot.slane %v1231_v55, 2  ;;  %v1237_v58 = vrot.slane %v1231_v55, 3  ;;  %v1238_v59 = vrot.slane %v1231_v55, 4 }
 0x3ae   :  { %1074 = vst.msk [vmem:[%s2672_s4 + $0xd] sm:$0x1] %vm192_vm8, %v1059_v49  ;;  %v1239_v60 = vrot.slane %v1231_v55, 5  ;;  %v1240_v63 = vrot.slane %v1231_v55, 6  ;;  %v1241_v0 = vrot.slane %v1231_v55, 7  ;;  %v1415_v7 = vrot.slane %v1407_v57, 5 }
 0x3af   :  { %1075 = vst.msk [vmem:[%s2672_s4 + $0x15] sm:$0x1] %vm192_vm8, %v1060_v50  ;;  %v1416_v5 = vrot.slane %v1407_v57, 6  ;;  %v1417_v8 = vrot.slane %v1407_v57, 7 }
 0x3b0   :  { %1076 = vst.msk [vmem:[%s2672_s4 + $0x1d] sm:$0x1] %vm192_vm8, %v1061_v51 }
 0x3b1   :  { %1077 = vst.msk [vmem:[%s2672_s4 + $0x25] sm:$0x1] %vm192_vm8, %v1062_v52 }
 0x3b2   :  { %1078 = vst.msk [vmem:[%s2672_s4 + $0x2d] sm:$0x1] %vm192_vm8, %v1063_v53 }
 0x3b3   :  { %1079 = vst.msk [vmem:[%s2672_s4 + $0x35] sm:$0x1] %vm192_vm8, %v1064_v54 }
 0x3b4   :  { %1080 = vst.msk [vmem:[%s2672_s4 + $0x3d] sm:$0x1] %vm192_vm8, %v1065_v56 }
 0x3b5   :  { %1249 = vst.msk [vmem:[%s2672_s4 + $0x6] sm:$0x1] %vm192_vm8, %v1231_v55 }
 0x3b6   :  { %1250 = vst.msk [vmem:[%s2672_s4 + $0xe] sm:$0x1] %vm192_vm8, %v1235_v61 }
 0x3b7   :  { %1251 = vst.msk [vmem:[%s2672_s4 + $0x16] sm:$0x1] %vm192_vm8, %v1236_v6 }
 0x3b8   :  { %1252 = vst.msk [vmem:[%s2672_s4 + $0x1e] sm:$0x1] %vm192_vm8, %v1237_v58 }
 0x3b9   :  { %1253 = vst.msk [vmem:[%s2672_s4 + $0x26] sm:$0x1] %vm192_vm8, %v1238_v59 }
 0x3ba   :  { %1254 = vst.msk [vmem:[%s2672_s4 + $0x2e] sm:$0x1] %vm192_vm8, %v1239_v60 }
 0x3bb   :  { %1255 = vst.msk [vmem:[%s2672_s4 + $0x36] sm:$0x1] %vm192_vm8, %v1240_v63 }
 0x3bc   :  { %1256 = vst.msk [vmem:[%s2672_s4 + $0x3e] sm:$0x1] %vm192_vm8, %v1241_v0 }
 0x3bd   :  { %1425 = vst.msk [vmem:[%s2672_s4 + $0x7] sm:$0x1] %vm192_vm8, %v1407_v57 }
 0x3be   :  { %1426 = vst.msk [vmem:[%s2672_s4 + $0xf] sm:$0x1] %vm192_vm8, %v1411_v1 }
 0x3bf   :  { %1427 = vst.msk [vmem:[%s2672_s4 + $0x17] sm:$0x1] %vm192_vm8, %v1412_v27 }
 0x3c0   :  { %1428 = vst.msk [vmem:[%s2672_s4 + $0x1f] sm:$0x1] %vm192_vm8, %v1413_v3 }
 0x3c1   :  { %1429 = vst.msk [vmem:[%s2672_s4 + $0x27] sm:$0x1] %vm192_vm8, %v1414_v4 }
 0x3c2   :  { %1430 = vst.msk [vmem:[%s2672_s4 + $0x2f] sm:$0x1] %vm192_vm8, %v1415_v7 }
 0x3c3   :  { %1431 = vst.msk [vmem:[%s2672_s4 + $0x37] sm:$0x1] %vm192_vm8, %v1416_v5 }
 0x3c4   :  { %1432 = vst.msk [vmem:[%s2672_s4 + $0x3f] sm:$0x1] %vm192_vm8, %v1417_v8 }

</bundles_post_ra>
